<compile_context>
chip_gen: v7x
topology: tpu7x:2x2x1
jax: 0.10.0
libtpu: 0.0.40
codegen_flags: <defaults>
</compile_context>

<pallas_src>
import math
import jax
import jax.numpy as jnp
from jax.experimental import pallas as pl
from jax.experimental.pallas import tpu as pltpu


# ------------------------------ Pallas kernel -------------------------------

def make_fused_lstm_kernel(num_layers, T, B, H):
    """Kernel for `num_layers` stacked LSTM layers + final Linear.

    Ref order: x, (wih_l, whh_l, b_l for l=0..L-1), fc_w, fc_b, out.
      x    : (T*B, I)    time-major flattened input (row t*B + b)
      wih_l: (in_dim,4H) fused input weights, gate order i,f,g,o
      whh_l: (H, 4H)     fused recurrent weights
      b_l  : (1, 4H)     fused bias (b_ih + b_hh)
      fc_w : (H, O), fc_b: (1, O), out: (B, O)
    """
    G = 4 * H

    def kernel(*refs):
        it = iter(refs)
        x_ref = next(it)
        wih_refs, whh_refs, b_refs = [], [], []
        for _ in range(num_layers):
            wih_refs.append(next(it))
            whh_refs.append(next(it))
            b_refs.append(next(it))
        fcw_ref = next(it)
        fcb_ref = next(it)
        out_ref = next(it)

        # Layer-0 x-path projection fused into the kernel: one
        # (T*B, I) @ (I, 4H) matmul + bias, h-independent, off the recurrence.
        # Dense (T*B, 4H) layout -> exactly two (8,128) vreg tiles for T=8,B=2.
        xp = (jnp.dot(x_ref[...], wih_refs[0][...],
                      preferred_element_type=jnp.float32)
              + b_refs[0][...])                                   # (T*B, 4H)

        h = jnp.zeros((B, H), jnp.float32)
        for l in range(num_layers):
            whh = whh_refs[l][...]                                # (H, 4H)
            h = jnp.zeros((B, H), jnp.float32)
            c = jnp.zeros((B, H), jnp.float32)
            hs = []
            # T is small & static -> fully unrolled; per step the only
            # sequential work is one (B,H)@(H,4H) matmul + gate math.
            for t in range(T):
                z = xp[t * B:(t + 1) * B, :] + jnp.dot(
                    h, whh, preferred_element_type=jnp.float32)   # (B, 4H)
                # Consolidated transcendentals: one sigmoid + one tanh over the
                # whole (B, 4H) vreg, then slice gates (wasted lanes are free;
                # EUP latency on the serial chain is the binding cost).
                sig = jax.nn.sigmoid(z)
                th = jnp.tanh(z)
                i_g = sig[:, 0 * H:1 * H]
                f_g = sig[:, 1 * H:2 * H]
                g_g = th[:, 2 * H:3 * H]
                o_g = sig[:, 3 * H:4 * H]
                c = f_g * c + i_g * g_g
                h = o_g * jnp.tanh(c)
                hs.append(h)

            if l + 1 < num_layers:
                # Next layer's x-path depends only on this layer's outputs:
                # batch all timesteps into ONE (T*B, H)@(H, 4H) matmul + one
                # bias add, off the next layer's sequential critical path.
                h_all = jnp.concatenate(hs, axis=0)               # (T*B, H)
                xp = (jnp.dot(h_all, wih_refs[l + 1][...],
                              preferred_element_type=jnp.float32)
                      + b_refs[l + 1][...])                       # (T*B, 4H)

        # Final Linear on the last timestep of the top layer (== out[:, -1, :]).
        out_ref[...] = (jnp.dot(h, fcw_ref[...],
                                preferred_element_type=jnp.float32)
                        + fcb_ref[...])

    return kernel


# -------------------------------- wrapper ------------------------------------

def rnn_forward(x_bti, params):
    """Forward pass matching the PyTorch RNN module.

    x_bti: (B, T, input_size) batch_first, float32.  Returns (B, output_size).
    """
    layers = params["layers"]
    num_layers = len(layers)
    H = layers[0][1].shape[0]
    O = params["fc_w_t"].shape[-1]

    B, T, I = x_bti.shape
    # Time-major, flattened to (T*B, I): row t*B + b holds timestep t, batch b.
    x_flat = (jnp.transpose(x_bti, (1, 0, 2))
              .reshape(T * B, I).astype(jnp.float32))

    inputs = [x_flat]
    for (wih_l, whh_l, b_l) in layers:
        inputs += [wih_l, whh_l, b_l]
    inputs += [params["fc_w_t"], params["fc_b"]]

    kernel = make_fused_lstm_kernel(num_layers, T, B, H)
    return pl.pallas_call(
        kernel,
        out_shape=jax.ShapeDtypeStruct((B, O), jnp.float32),
        in_specs=[pl.BlockSpec(memory_space=pltpu.MemorySpace.VMEM)] * len(inputs),
        out_specs=pl.BlockSpec(memory_space=pltpu.MemorySpace.VMEM),
    )(*inputs)


# ------------------------- parameter construction ---------------------------

def make_params(key, input_size, hidden_size, num_layers, output_size):
    """Deterministic init mimicking PyTorch's uniform(-1/sqrt(H), 1/sqrt(H)).

    Weights are stored gate-fused and pre-transposed:
      wih: (in_dim, 4H), whh: (H, 4H), b: (1, 4H)  with gate order i,f,g,o.
    """
    stdv = 1.0 / math.sqrt(hidden_size)
    layers = []
    for layer in range(num_layers):
        in_dim = input_size if layer == 0 else hidden_size
        key, k1, k2, k3, k4 = jax.random.split(key, 5)
        w_ih = jax.random.uniform(k1, (4 * hidden_size, in_dim),
                                  minval=-stdv, maxval=stdv, dtype=jnp.float32)
        w_hh = jax.random.uniform(k2, (4 * hidden_size, hidden_size),
                                  minval=-stdv, maxval=stdv, dtype=jnp.float32)
        b_ih = jax.random.uniform(k3, (4 * hidden_size,),
                                  minval=-stdv, maxval=stdv, dtype=jnp.float32)
        b_hh = jax.random.uniform(k4, (4 * hidden_size,),
                                  minval=-stdv, maxval=stdv, dtype=jnp.float32)
        wih_f = jnp.transpose(w_ih)                               # (in_dim, 4H)
        whh_f = jnp.transpose(w_hh)                               # (H, 4H)
        b_f = (b_ih + b_hh).reshape(1, 4 * hidden_size)           # (1, 4H)
        layers.append((wih_f, whh_f, b_f))

    key, k1, k2 = jax.random.split(key, 3)
    fc_w = jax.random.uniform(k1, (output_size, hidden_size),
                              minval=-stdv, maxval=stdv, dtype=jnp.float32)
    fc_b = jax.random.uniform(k2, (output_size,),
                              minval=-stdv, maxval=stdv, dtype=jnp.float32)
    return {
        "layers": layers,
        "fc_w_t": jnp.transpose(fc_w),           # (H, O)
        "fc_b": fc_b.reshape(1, output_size),    # (1, O)
    }


# --------------------------- pure-JAX reference ------------------------------

def rnn_reference(x_bti, params):
    x = jnp.transpose(x_bti, (1, 0, 2))          # (T, B, I)
    T, B, _ = x.shape
    for (wih, whh, b) in params["layers"]:
        H = whh.shape[0]
        h = jnp.zeros((B, H), jnp.float32)
        c = jnp.zeros((B, H), jnp.float32)
        outs = []
        for t in range(T):
            z = x[t] @ wih + h @ whh + b         # (B, 4H)
            i = jax.nn.sigmoid(z[:, 0 * H:1 * H])
            f = jax.nn.sigmoid(z[:, 1 * H:2 * H])
            g = jnp.tanh(z[:, 2 * H:3 * H])
            o = jax.nn.sigmoid(z[:, 3 * H:4 * H])
            c = f * c + i * g
            h = o * jnp.tanh(c)
            outs.append(h)
        x = jnp.stack(outs, axis=0)
    return x[-1] @ params["fc_w_t"] + params["fc_b"]


# --------------------------------- main --------------------------------------

if __name__ == "__main__":
    fs = 500
    input_size = int(0.2 * fs)   # 100, as in the PyTorch module
    hidden_size = 32
    num_layers = 2
    output_size = 4
    batch = 2
    seq_len = 8

    key = jax.random.PRNGKey(0)
    kx, kp = jax.random.split(key)
    x = jax.random.normal(kx, (batch, seq_len, input_size), dtype=jnp.float32)
    params = make_params(kp, input_size, hidden_size, num_layers, output_size)

    fwd = jax.jit(rnn_forward)
    out = jax.block_until_ready(fwd(x, params))

    ref = rnn_reference(x, params)
    assert out.shape == (batch, output_size)
    max_err = jnp.max(jnp.abs(out - ref))
    assert jnp.allclose(out, ref, atol=1e-4, rtol=1e-4), f"max abs err {max_err}"

    print("KERNEL_OK")
</pallas_src>

<mosaic_0001>
module attributes {stable_mosaic.version = 11 : i64} {
  func.func @kernel(%arg0: memref<16x100xf32, #tpu.memory_space<vmem>>, %arg1: memref<100x128xf32, #tpu.memory_space<vmem>>, %arg2: memref<32x128xf32, #tpu.memory_space<vmem>>, %arg3: memref<1x128xf32, #tpu.memory_space<vmem>>, %arg4: memref<32x128xf32, #tpu.memory_space<vmem>>, %arg5: memref<32x128xf32, #tpu.memory_space<vmem>>, %arg6: memref<1x128xf32, #tpu.memory_space<vmem>>, %arg7: memref<32x4xf32, #tpu.memory_space<vmem>>, %arg8: memref<1x4xf32, #tpu.memory_space<vmem>>, %arg9: memref<2x4xf32, #tpu.memory_space<vmem>>) attributes {dimension_semantics = [], scalar_prefetch = 0 : i64, scratch_operands = 0 : i64, tpu.core_type = #tpu.core_type<tc>} {
    %c0 = arith.constant 0 : index
    %c0_0 = arith.constant 0 : index
    %0 = vector.load %arg0[%c0, %c0_0] : memref<16x100xf32, #tpu.memory_space<vmem>>, vector<16x100xf32>
    %c0_1 = arith.constant 0 : index
    %c0_2 = arith.constant 0 : index
    %1 = vector.load %arg1[%c0_1, %c0_2] : memref<100x128xf32, #tpu.memory_space<vmem>>, vector<100x128xf32>
    %cst = arith.constant dense<0.000000e+00> : vector<16x128xf32>
    %2 = tpu.matmul %0, %1, %cst {dimension_numbers = #tpu.dot_dimension_numbers<[1], [0], [0], [1], [0, 0, 1, 1], [], []>} : vector<16x100xf32>, vector<100x128xf32>, vector<16x128xf32> -> vector<16x128xf32>
    %c0_3 = arith.constant 0 : index
    %c0_4 = arith.constant 0 : index
    %3 = vector.load %arg3[%c0_3, %c0_4] : memref<1x128xf32, #tpu.memory_space<vmem>>, vector<1x128xf32>
    %4 = vector.broadcast %3 : vector<1x128xf32> to vector<16x128xf32>
    %5 = arith.addf %2, %4 : vector<16x128xf32>
    %c0_5 = arith.constant 0 : index
    %c0_6 = arith.constant 0 : index
    %6 = vector.load %arg2[%c0_5, %c0_6] : memref<32x128xf32, #tpu.memory_space<vmem>>, vector<32x128xf32>
    %cst_7 = arith.constant 0.000000e+00 : f32
    %7 = vector.broadcast %cst_7 : f32 to vector<2x32xf32>
    %cst_8 = arith.constant 0.000000e+00 : f32
    %8 = vector.broadcast %cst_8 : f32 to vector<2x32xf32>
    %9 = vector.extract_strided_slice %5 {offsets = [0, 0], sizes = [2, 128], strides = [1, 1]} : vector<16x128xf32> to vector<2x128xf32>
    %cst_9 = arith.constant dense<0.000000e+00> : vector<2x128xf32>
    %10 = tpu.matmul %7, %6, %cst_9 {dimension_numbers = #tpu.dot_dimension_numbers<[1], [0], [0], [1], [0, 0, 1, 1], [], []>} : vector<2x32xf32>, vector<32x128xf32>, vector<2x128xf32> -> vector<2x128xf32>
    %11 = arith.addf %9, %10 : vector<2x128xf32>
    %12 = arith.negf %11 : vector<2x128xf32>
    %13 = math.exp %12 : vector<2x128xf32>
    %cst_10 = arith.constant 1.000000e+00 : f32
    %14 = vector.broadcast %cst_10 : f32 to vector<2x128xf32>
    %15 = arith.addf %14, %13 : vector<2x128xf32>
    %16 = arith.divf %14, %15 : vector<2x128xf32>
    %17 = math.tanh %11 : vector<2x128xf32>
    %18 = vector.extract_strided_slice %16 {offsets = [0, 0], sizes = [2, 32], strides = [1, 1]} : vector<2x128xf32> to vector<2x32xf32>
    %19 = vector.extract_strided_slice %16 {offsets = [0, 32], sizes = [2, 32], strides = [1, 1]} : vector<2x128xf32> to vector<2x32xf32>
    %20 = vector.extract_strided_slice %17 {offsets = [0, 64], sizes = [2, 32], strides = [1, 1]} : vector<2x128xf32> to vector<2x32xf32>
    %21 = vector.extract_strided_slice %16 {offsets = [0, 96], sizes = [2, 32], strides = [1, 1]} : vector<2x128xf32> to vector<2x32xf32>
    %22 = arith.mulf %19, %8 : vector<2x32xf32>
    %23 = arith.mulf %18, %20 : vector<2x32xf32>
    %24 = arith.addf %22, %23 : vector<2x32xf32>
    %25 = math.tanh %24 : vector<2x32xf32>
    %26 = arith.mulf %21, %25 : vector<2x32xf32>
    %27 = vector.extract_strided_slice %5 {offsets = [2, 0], sizes = [2, 128], strides = [1, 1]} : vector<16x128xf32> to vector<2x128xf32>
    %cst_11 = arith.constant dense<0.000000e+00> : vector<2x128xf32>
    %28 = tpu.matmul %26, %6, %cst_11 {dimension_numbers = #tpu.dot_dimension_numbers<[1], [0], [0], [1], [0, 0, 1, 1], [], []>} : vector<2x32xf32>, vector<32x128xf32>, vector<2x128xf32> -> vector<2x128xf32>
    %29 = arith.addf %27, %28 : vector<2x128xf32>
    %30 = arith.negf %29 : vector<2x128xf32>
    %31 = math.exp %30 : vector<2x128xf32>
    %cst_12 = arith.constant 1.000000e+00 : f32
    %32 = vector.broadcast %cst_12 : f32 to vector<2x128xf32>
    %33 = arith.addf %32, %31 : vector<2x128xf32>
    %34 = arith.divf %32, %33 : vector<2x128xf32>
    %35 = math.tanh %29 : vector<2x128xf32>
    %36 = vector.extract_strided_slice %34 {offsets = [0, 0], sizes = [2, 32], strides = [1, 1]} : vector<2x128xf32> to vector<2x32xf32>
    %37 = vector.extract_strided_slice %34 {offsets = [0, 32], sizes = [2, 32], strides = [1, 1]} : vector<2x128xf32> to vector<2x32xf32>
    %38 = vector.extract_strided_slice %35 {offsets = [0, 64], sizes = [2, 32], strides = [1, 1]} : vector<2x128xf32> to vector<2x32xf32>
    %39 = vector.extract_strided_slice %34 {offsets = [0, 96], sizes = [2, 32], strides = [1, 1]} : vector<2x128xf32> to vector<2x32xf32>
    %40 = arith.mulf %37, %24 : vector<2x32xf32>
    %41 = arith.mulf %36, %38 : vector<2x32xf32>
    %42 = arith.addf %40, %41 : vector<2x32xf32>
    %43 = math.tanh %42 : vector<2x32xf32>
    %44 = arith.mulf %39, %43 : vector<2x32xf32>
    %45 = vector.extract_strided_slice %5 {offsets = [4, 0], sizes = [2, 128], strides = [1, 1]} : vector<16x128xf32> to vector<2x128xf32>
    %cst_13 = arith.constant dense<0.000000e+00> : vector<2x128xf32>
    %46 = tpu.matmul %44, %6, %cst_13 {dimension_numbers = #tpu.dot_dimension_numbers<[1], [0], [0], [1], [0, 0, 1, 1], [], []>} : vector<2x32xf32>, vector<32x128xf32>, vector<2x128xf32> -> vector<2x128xf32>
    %47 = arith.addf %45, %46 : vector<2x128xf32>
    %48 = arith.negf %47 : vector<2x128xf32>
    %49 = math.exp %48 : vector<2x128xf32>
    %cst_14 = arith.constant 1.000000e+00 : f32
    %50 = vector.broadcast %cst_14 : f32 to vector<2x128xf32>
    %51 = arith.addf %50, %49 : vector<2x128xf32>
    %52 = arith.divf %50, %51 : vector<2x128xf32>
    %53 = math.tanh %47 : vector<2x128xf32>
    %54 = vector.extract_strided_slice %52 {offsets = [0, 0], sizes = [2, 32], strides = [1, 1]} : vector<2x128xf32> to vector<2x32xf32>
    %55 = vector.extract_strided_slice %52 {offsets = [0, 32], sizes = [2, 32], strides = [1, 1]} : vector<2x128xf32> to vector<2x32xf32>
    %56 = vector.extract_strided_slice %53 {offsets = [0, 64], sizes = [2, 32], strides = [1, 1]} : vector<2x128xf32> to vector<2x32xf32>
    %57 = vector.extract_strided_slice %52 {offsets = [0, 96], sizes = [2, 32], strides = [1, 1]} : vector<2x128xf32> to vector<2x32xf32>
    %58 = arith.mulf %55, %42 : vector<2x32xf32>
    %59 = arith.mulf %54, %56 : vector<2x32xf32>
    %60 = arith.addf %58, %59 : vector<2x32xf32>
    %61 = math.tanh %60 : vector<2x32xf32>
    %62 = arith.mulf %57, %61 : vector<2x32xf32>
    %63 = vector.extract_strided_slice %5 {offsets = [6, 0], sizes = [2, 128], strides = [1, 1]} : vector<16x128xf32> to vector<2x128xf32>
    %cst_15 = arith.constant dense<0.000000e+00> : vector<2x128xf32>
    %64 = tpu.matmul %62, %6, %cst_15 {dimension_numbers = #tpu.dot_dimension_numbers<[1], [0], [0], [1], [0, 0, 1, 1], [], []>} : vector<2x32xf32>, vector<32x128xf32>, vector<2x128xf32> -> vector<2x128xf32>
    %65 = arith.addf %63, %64 : vector<2x128xf32>
    %66 = arith.negf %65 : vector<2x128xf32>
    %67 = math.exp %66 : vector<2x128xf32>
    %cst_16 = arith.constant 1.000000e+00 : f32
    %68 = vector.broadcast %cst_16 : f32 to vector<2x128xf32>
    %69 = arith.addf %68, %67 : vector<2x128xf32>
    %70 = arith.divf %68, %69 : vector<2x128xf32>
    %71 = math.tanh %65 : vector<2x128xf32>
    %72 = vector.extract_strided_slice %70 {offsets = [0, 0], sizes = [2, 32], strides = [1, 1]} : vector<2x128xf32> to vector<2x32xf32>
    %73 = vector.extract_strided_slice %70 {offsets = [0, 32], sizes = [2, 32], strides = [1, 1]} : vector<2x128xf32> to vector<2x32xf32>
    %74 = vector.extract_strided_slice %71 {offsets = [0, 64], sizes = [2, 32], strides = [1, 1]} : vector<2x128xf32> to vector<2x32xf32>
    %75 = vector.extract_strided_slice %70 {offsets = [0, 96], sizes = [2, 32], strides = [1, 1]} : vector<2x128xf32> to vector<2x32xf32>
    %76 = arith.mulf %73, %60 : vector<2x32xf32>
    %77 = arith.mulf %72, %74 : vector<2x32xf32>
    %78 = arith.addf %76, %77 : vector<2x32xf32>
    %79 = math.tanh %78 : vector<2x32xf32>
    %80 = arith.mulf %75, %79 : vector<2x32xf32>
    %81 = vector.extract_strided_slice %5 {offsets = [8, 0], sizes = [2, 128], strides = [1, 1]} : vector<16x128xf32> to vector<2x128xf32>
    %cst_17 = arith.constant dense<0.000000e+00> : vector<2x128xf32>
    %82 = tpu.matmul %80, %6, %cst_17 {dimension_numbers = #tpu.dot_dimension_numbers<[1], [0], [0], [1], [0, 0, 1, 1], [], []>} : vector<2x32xf32>, vector<32x128xf32>, vector<2x128xf32> -> vector<2x128xf32>
    %83 = arith.addf %81, %82 : vector<2x128xf32>
    %84 = arith.negf %83 : vector<2x128xf32>
    %85 = math.exp %84 : vector<2x128xf32>
    %cst_18 = arith.constant 1.000000e+00 : f32
    %86 = vector.broadcast %cst_18 : f32 to vector<2x128xf32>
    %87 = arith.addf %86, %85 : vector<2x128xf32>
    %88 = arith.divf %86, %87 : vector<2x128xf32>
    %89 = math.tanh %83 : vector<2x128xf32>
    %90 = vector.extract_strided_slice %88 {offsets = [0, 0], sizes = [2, 32], strides = [1, 1]} : vector<2x128xf32> to vector<2x32xf32>
    %91 = vector.extract_strided_slice %88 {offsets = [0, 32], sizes = [2, 32], strides = [1, 1]} : vector<2x128xf32> to vector<2x32xf32>
    %92 = vector.extract_strided_slice %89 {offsets = [0, 64], sizes = [2, 32], strides = [1, 1]} : vector<2x128xf32> to vector<2x32xf32>
    %93 = vector.extract_strided_slice %88 {offsets = [0, 96], sizes = [2, 32], strides = [1, 1]} : vector<2x128xf32> to vector<2x32xf32>
    %94 = arith.mulf %91, %78 : vector<2x32xf32>
    %95 = arith.mulf %90, %92 : vector<2x32xf32>
    %96 = arith.addf %94, %95 : vector<2x32xf32>
    %97 = math.tanh %96 : vector<2x32xf32>
    %98 = arith.mulf %93, %97 : vector<2x32xf32>
    %99 = vector.extract_strided_slice %5 {offsets = [10, 0], sizes = [2, 128], strides = [1, 1]} : vector<16x128xf32> to vector<2x128xf32>
    %cst_19 = arith.constant dense<0.000000e+00> : vector<2x128xf32>
    %100 = tpu.matmul %98, %6, %cst_19 {dimension_numbers = #tpu.dot_dimension_numbers<[1], [0], [0], [1], [0, 0, 1, 1], [], []>} : vector<2x32xf32>, vector<32x128xf32>, vector<2x128xf32> -> vector<2x128xf32>
    %101 = arith.addf %99, %100 : vector<2x128xf32>
    %102 = arith.negf %101 : vector<2x128xf32>
    %103 = math.exp %102 : vector<2x128xf32>
    %cst_20 = arith.constant 1.000000e+00 : f32
    %104 = vector.broadcast %cst_20 : f32 to vector<2x128xf32>
    %105 = arith.addf %104, %103 : vector<2x128xf32>
    %106 = arith.divf %104, %105 : vector<2x128xf32>
    %107 = math.tanh %101 : vector<2x128xf32>
    %108 = vector.extract_strided_slice %106 {offsets = [0, 0], sizes = [2, 32], strides = [1, 1]} : vector<2x128xf32> to vector<2x32xf32>
    %109 = vector.extract_strided_slice %106 {offsets = [0, 32], sizes = [2, 32], strides = [1, 1]} : vector<2x128xf32> to vector<2x32xf32>
    %110 = vector.extract_strided_slice %107 {offsets = [0, 64], sizes = [2, 32], strides = [1, 1]} : vector<2x128xf32> to vector<2x32xf32>
    %111 = vector.extract_strided_slice %106 {offsets = [0, 96], sizes = [2, 32], strides = [1, 1]} : vector<2x128xf32> to vector<2x32xf32>
    %112 = arith.mulf %109, %96 : vector<2x32xf32>
    %113 = arith.mulf %108, %110 : vector<2x32xf32>
    %114 = arith.addf %112, %113 : vector<2x32xf32>
    %115 = math.tanh %114 : vector<2x32xf32>
    %116 = arith.mulf %111, %115 : vector<2x32xf32>
    %117 = vector.extract_strided_slice %5 {offsets = [12, 0], sizes = [2, 128], strides = [1, 1]} : vector<16x128xf32> to vector<2x128xf32>
    %cst_21 = arith.constant dense<0.000000e+00> : vector<2x128xf32>
    %118 = tpu.matmul %116, %6, %cst_21 {dimension_numbers = #tpu.dot_dimension_numbers<[1], [0], [0], [1], [0, 0, 1, 1], [], []>} : vector<2x32xf32>, vector<32x128xf32>, vector<2x128xf32> -> vector<2x128xf32>
    %119 = arith.addf %117, %118 : vector<2x128xf32>
    %120 = arith.negf %119 : vector<2x128xf32>
    %121 = math.exp %120 : vector<2x128xf32>
    %cst_22 = arith.constant 1.000000e+00 : f32
    %122 = vector.broadcast %cst_22 : f32 to vector<2x128xf32>
    %123 = arith.addf %122, %121 : vector<2x128xf32>
    %124 = arith.divf %122, %123 : vector<2x128xf32>
    %125 = math.tanh %119 : vector<2x128xf32>
    %126 = vector.extract_strided_slice %124 {offsets = [0, 0], sizes = [2, 32], strides = [1, 1]} : vector<2x128xf32> to vector<2x32xf32>
    %127 = vector.extract_strided_slice %124 {offsets = [0, 32], sizes = [2, 32], strides = [1, 1]} : vector<2x128xf32> to vector<2x32xf32>
    %128 = vector.extract_strided_slice %125 {offsets = [0, 64], sizes = [2, 32], strides = [1, 1]} : vector<2x128xf32> to vector<2x32xf32>
    %129 = vector.extract_strided_slice %124 {offsets = [0, 96], sizes = [2, 32], strides = [1, 1]} : vector<2x128xf32> to vector<2x32xf32>
    %130 = arith.mulf %127, %114 : vector<2x32xf32>
    %131 = arith.mulf %126, %128 : vector<2x32xf32>
    %132 = arith.addf %130, %131 : vector<2x32xf32>
    %133 = math.tanh %132 : vector<2x32xf32>
    %134 = arith.mulf %129, %133 : vector<2x32xf32>
    %135 = vector.extract_strided_slice %5 {offsets = [14, 0], sizes = [2, 128], strides = [1, 1]} : vector<16x128xf32> to vector<2x128xf32>
    %cst_23 = arith.constant dense<0.000000e+00> : vector<2x128xf32>
    %136 = tpu.matmul %134, %6, %cst_23 {dimension_numbers = #tpu.dot_dimension_numbers<[1], [0], [0], [1], [0, 0, 1, 1], [], []>} : vector<2x32xf32>, vector<32x128xf32>, vector<2x128xf32> -> vector<2x128xf32>
    %137 = arith.addf %135, %136 : vector<2x128xf32>
    %138 = arith.negf %137 : vector<2x128xf32>
    %139 = math.exp %138 : vector<2x128xf32>
    %cst_24 = arith.constant 1.000000e+00 : f32
    %140 = vector.broadcast %cst_24 : f32 to vector<2x128xf32>
    %141 = arith.addf %140, %139 : vector<2x128xf32>
    %142 = arith.divf %140, %141 : vector<2x128xf32>
    %143 = math.tanh %137 : vector<2x128xf32>
    %144 = vector.extract_strided_slice %142 {offsets = [0, 0], sizes = [2, 32], strides = [1, 1]} : vector<2x128xf32> to vector<2x32xf32>
    %145 = vector.extract_strided_slice %142 {offsets = [0, 32], sizes = [2, 32], strides = [1, 1]} : vector<2x128xf32> to vector<2x32xf32>
    %146 = vector.extract_strided_slice %143 {offsets = [0, 64], sizes = [2, 32], strides = [1, 1]} : vector<2x128xf32> to vector<2x32xf32>
    %147 = vector.extract_strided_slice %142 {offsets = [0, 96], sizes = [2, 32], strides = [1, 1]} : vector<2x128xf32> to vector<2x32xf32>
    %148 = arith.mulf %145, %132 : vector<2x32xf32>
    %149 = arith.mulf %144, %146 : vector<2x32xf32>
    %150 = arith.addf %148, %149 : vector<2x32xf32>
    %151 = math.tanh %150 : vector<2x32xf32>
    %152 = arith.mulf %147, %151 : vector<2x32xf32>
    %153 = tpu.concatenate %26, %44, %62, %80, %98, %116, %134, %152 in 0 : vector<2x32xf32>, vector<2x32xf32>, vector<2x32xf32>, vector<2x32xf32>, vector<2x32xf32>, vector<2x32xf32>, vector<2x32xf32>, vector<2x32xf32> -> vector<16x32xf32>
    %c0_25 = arith.constant 0 : index
    %c0_26 = arith.constant 0 : index
    %154 = vector.load %arg4[%c0_25, %c0_26] : memref<32x128xf32, #tpu.memory_space<vmem>>, vector<32x128xf32>
    %cst_27 = arith.constant dense<0.000000e+00> : vector<16x128xf32>
    %155 = tpu.matmul %153, %154, %cst_27 {dimension_numbers = #tpu.dot_dimension_numbers<[1], [0], [0], [1], [0, 0, 1, 1], [], []>} : vector<16x32xf32>, vector<32x128xf32>, vector<16x128xf32> -> vector<16x128xf32>
    %c0_28 = arith.constant 0 : index
    %c0_29 = arith.constant 0 : index
    %156 = vector.load %arg6[%c0_28, %c0_29] : memref<1x128xf32, #tpu.memory_space<vmem>>, vector<1x128xf32>
    %157 = vector.broadcast %156 : vector<1x128xf32> to vector<16x128xf32>
    %158 = arith.addf %155, %157 : vector<16x128xf32>
    %c0_30 = arith.constant 0 : index
    %c0_31 = arith.constant 0 : index
    %159 = vector.load %arg5[%c0_30, %c0_31] : memref<32x128xf32, #tpu.memory_space<vmem>>, vector<32x128xf32>
    %cst_32 = arith.constant 0.000000e+00 : f32
    %160 = vector.broadcast %cst_32 : f32 to vector<2x32xf32>
    %cst_33 = arith.constant 0.000000e+00 : f32
    %161 = vector.broadcast %cst_33 : f32 to vector<2x32xf32>
    %162 = vector.extract_strided_slice %158 {offsets = [0, 0], sizes = [2, 128], strides = [1, 1]} : vector<16x128xf32> to vector<2x128xf32>
    %cst_34 = arith.constant dense<0.000000e+00> : vector<2x128xf32>
    %163 = tpu.matmul %160, %159, %cst_34 {dimension_numbers = #tpu.dot_dimension_numbers<[1], [0], [0], [1], [0, 0, 1, 1], [], []>} : vector<2x32xf32>, vector<32x128xf32>, vector<2x128xf32> -> vector<2x128xf32>
    %164 = arith.addf %162, %163 : vector<2x128xf32>
    %165 = arith.negf %164 : vector<2x128xf32>
    %166 = math.exp %165 : vector<2x128xf32>
    %cst_35 = arith.constant 1.000000e+00 : f32
    %167 = vector.broadcast %cst_35 : f32 to vector<2x128xf32>
    %168 = arith.addf %167, %166 : vector<2x128xf32>
    %169 = arith.divf %167, %168 : vector<2x128xf32>
    %170 = math.tanh %164 : vector<2x128xf32>
    %171 = vector.extract_strided_slice %169 {offsets = [0, 0], sizes = [2, 32], strides = [1, 1]} : vector<2x128xf32> to vector<2x32xf32>
    %172 = vector.extract_strided_slice %169 {offsets = [0, 32], sizes = [2, 32], strides = [1, 1]} : vector<2x128xf32> to vector<2x32xf32>
    %173 = vector.extract_strided_slice %170 {offsets = [0, 64], sizes = [2, 32], strides = [1, 1]} : vector<2x128xf32> to vector<2x32xf32>
    %174 = vector.extract_strided_slice %169 {offsets = [0, 96], sizes = [2, 32], strides = [1, 1]} : vector<2x128xf32> to vector<2x32xf32>
    %175 = arith.mulf %172, %161 : vector<2x32xf32>
    %176 = arith.mulf %171, %173 : vector<2x32xf32>
    %177 = arith.addf %175, %176 : vector<2x32xf32>
    %178 = math.tanh %177 : vector<2x32xf32>
    %179 = arith.mulf %174, %178 : vector<2x32xf32>
    %180 = vector.extract_strided_slice %158 {offsets = [2, 0], sizes = [2, 128], strides = [1, 1]} : vector<16x128xf32> to vector<2x128xf32>
    %cst_36 = arith.constant dense<0.000000e+00> : vector<2x128xf32>
    %181 = tpu.matmul %179, %159, %cst_36 {dimension_numbers = #tpu.dot_dimension_numbers<[1], [0], [0], [1], [0, 0, 1, 1], [], []>} : vector<2x32xf32>, vector<32x128xf32>, vector<2x128xf32> -> vector<2x128xf32>
    %182 = arith.addf %180, %181 : vector<2x128xf32>
    %183 = arith.negf %182 : vector<2x128xf32>
    %184 = math.exp %183 : vector<2x128xf32>
    %cst_37 = arith.constant 1.000000e+00 : f32
    %185 = vector.broadcast %cst_37 : f32 to vector<2x128xf32>
    %186 = arith.addf %185, %184 : vector<2x128xf32>
    %187 = arith.divf %185, %186 : vector<2x128xf32>
    %188 = math.tanh %182 : vector<2x128xf32>
    %189 = vector.extract_strided_slice %187 {offsets = [0, 0], sizes = [2, 32], strides = [1, 1]} : vector<2x128xf32> to vector<2x32xf32>
    %190 = vector.extract_strided_slice %187 {offsets = [0, 32], sizes = [2, 32], strides = [1, 1]} : vector<2x128xf32> to vector<2x32xf32>
    %191 = vector.extract_strided_slice %188 {offsets = [0, 64], sizes = [2, 32], strides = [1, 1]} : vector<2x128xf32> to vector<2x32xf32>
    %192 = vector.extract_strided_slice %187 {offsets = [0, 96], sizes = [2, 32], strides = [1, 1]} : vector<2x128xf32> to vector<2x32xf32>
    %193 = arith.mulf %190, %177 : vector<2x32xf32>
    %194 = arith.mulf %189, %191 : vector<2x32xf32>
    %195 = arith.addf %193, %194 : vector<2x32xf32>
    %196 = math.tanh %195 : vector<2x32xf32>
    %197 = arith.mulf %192, %196 : vector<2x32xf32>
    %198 = vector.extract_strided_slice %158 {offsets = [4, 0], sizes = [2, 128], strides = [1, 1]} : vector<16x128xf32> to vector<2x128xf32>
    %cst_38 = arith.constant dense<0.000000e+00> : vector<2x128xf32>
    %199 = tpu.matmul %197, %159, %cst_38 {dimension_numbers = #tpu.dot_dimension_numbers<[1], [0], [0], [1], [0, 0, 1, 1], [], []>} : vector<2x32xf32>, vector<32x128xf32>, vector<2x128xf32> -> vector<2x128xf32>
    %200 = arith.addf %198, %199 : vector<2x128xf32>
    %201 = arith.negf %200 : vector<2x128xf32>
    %202 = math.exp %201 : vector<2x128xf32>
    %cst_39 = arith.constant 1.000000e+00 : f32
    %203 = vector.broadcast %cst_39 : f32 to vector<2x128xf32>
    %204 = arith.addf %203, %202 : vector<2x128xf32>
    %205 = arith.divf %203, %204 : vector<2x128xf32>
    %206 = math.tanh %200 : vector<2x128xf32>
    %207 = vector.extract_strided_slice %205 {offsets = [0, 0], sizes = [2, 32], strides = [1, 1]} : vector<2x128xf32> to vector<2x32xf32>
    %208 = vector.extract_strided_slice %205 {offsets = [0, 32], sizes = [2, 32], strides = [1, 1]} : vector<2x128xf32> to vector<2x32xf32>
    %209 = vector.extract_strided_slice %206 {offsets = [0, 64], sizes = [2, 32], strides = [1, 1]} : vector<2x128xf32> to vector<2x32xf32>
    %210 = vector.extract_strided_slice %205 {offsets = [0, 96], sizes = [2, 32], strides = [1, 1]} : vector<2x128xf32> to vector<2x32xf32>
    %211 = arith.mulf %208, %195 : vector<2x32xf32>
    %212 = arith.mulf %207, %209 : vector<2x32xf32>
    %213 = arith.addf %211, %212 : vector<2x32xf32>
    %214 = math.tanh %213 : vector<2x32xf32>
    %215 = arith.mulf %210, %214 : vector<2x32xf32>
    %216 = vector.extract_strided_slice %158 {offsets = [6, 0], sizes = [2, 128], strides = [1, 1]} : vector<16x128xf32> to vector<2x128xf32>
    %cst_40 = arith.constant dense<0.000000e+00> : vector<2x128xf32>
    %217 = tpu.matmul %215, %159, %cst_40 {dimension_numbers = #tpu.dot_dimension_numbers<[1], [0], [0], [1], [0, 0, 1, 1], [], []>} : vector<2x32xf32>, vector<32x128xf32>, vector<2x128xf32> -> vector<2x128xf32>
    %218 = arith.addf %216, %217 : vector<2x128xf32>
    %219 = arith.negf %218 : vector<2x128xf32>
    %220 = math.exp %219 : vector<2x128xf32>
    %cst_41 = arith.constant 1.000000e+00 : f32
    %221 = vector.broadcast %cst_41 : f32 to vector<2x128xf32>
    %222 = arith.addf %221, %220 : vector<2x128xf32>
    %223 = arith.divf %221, %222 : vector<2x128xf32>
    %224 = math.tanh %218 : vector<2x128xf32>
    %225 = vector.extract_strided_slice %223 {offsets = [0, 0], sizes = [2, 32], strides = [1, 1]} : vector<2x128xf32> to vector<2x32xf32>
    %226 = vector.extract_strided_slice %223 {offsets = [0, 32], sizes = [2, 32], strides = [1, 1]} : vector<2x128xf32> to vector<2x32xf32>
    %227 = vector.extract_strided_slice %224 {offsets = [0, 64], sizes = [2, 32], strides = [1, 1]} : vector<2x128xf32> to vector<2x32xf32>
    %228 = vector.extract_strided_slice %223 {offsets = [0, 96], sizes = [2, 32], strides = [1, 1]} : vector<2x128xf32> to vector<2x32xf32>
    %229 = arith.mulf %226, %213 : vector<2x32xf32>
    %230 = arith.mulf %225, %227 : vector<2x32xf32>
    %231 = arith.addf %229, %230 : vector<2x32xf32>
    %232 = math.tanh %231 : vector<2x32xf32>
    %233 = arith.mulf %228, %232 : vector<2x32xf32>
    %234 = vector.extract_strided_slice %158 {offsets = [8, 0], sizes = [2, 128], strides = [1, 1]} : vector<16x128xf32> to vector<2x128xf32>
    %cst_42 = arith.constant dense<0.000000e+00> : vector<2x128xf32>
    %235 = tpu.matmul %233, %159, %cst_42 {dimension_numbers = #tpu.dot_dimension_numbers<[1], [0], [0], [1], [0, 0, 1, 1], [], []>} : vector<2x32xf32>, vector<32x128xf32>, vector<2x128xf32> -> vector<2x128xf32>
    %236 = arith.addf %234, %235 : vector<2x128xf32>
    %237 = arith.negf %236 : vector<2x128xf32>
    %238 = math.exp %237 : vector<2x128xf32>
    %cst_43 = arith.constant 1.000000e+00 : f32
    %239 = vector.broadcast %cst_43 : f32 to vector<2x128xf32>
    %240 = arith.addf %239, %238 : vector<2x128xf32>
    %241 = arith.divf %239, %240 : vector<2x128xf32>
    %242 = math.tanh %236 : vector<2x128xf32>
    %243 = vector.extract_strided_slice %241 {offsets = [0, 0], sizes = [2, 32], strides = [1, 1]} : vector<2x128xf32> to vector<2x32xf32>
    %244 = vector.extract_strided_slice %241 {offsets = [0, 32], sizes = [2, 32], strides = [1, 1]} : vector<2x128xf32> to vector<2x32xf32>
    %245 = vector.extract_strided_slice %242 {offsets = [0, 64], sizes = [2, 32], strides = [1, 1]} : vector<2x128xf32> to vector<2x32xf32>
    %246 = vector.extract_strided_slice %241 {offsets = [0, 96], sizes = [2, 32], strides = [1, 1]} : vector<2x128xf32> to vector<2x32xf32>
    %247 = arith.mulf %244, %231 : vector<2x32xf32>
    %248 = arith.mulf %243, %245 : vector<2x32xf32>
    %249 = arith.addf %247, %248 : vector<2x32xf32>
    %250 = math.tanh %249 : vector<2x32xf32>
    %251 = arith.mulf %246, %250 : vector<2x32xf32>
    %252 = vector.extract_strided_slice %158 {offsets = [10, 0], sizes = [2, 128], strides = [1, 1]} : vector<16x128xf32> to vector<2x128xf32>
    %cst_44 = arith.constant dense<0.000000e+00> : vector<2x128xf32>
    %253 = tpu.matmul %251, %159, %cst_44 {dimension_numbers = #tpu.dot_dimension_numbers<[1], [0], [0], [1], [0, 0, 1, 1], [], []>} : vector<2x32xf32>, vector<32x128xf32>, vector<2x128xf32> -> vector<2x128xf32>
    %254 = arith.addf %252, %253 : vector<2x128xf32>
    %255 = arith.negf %254 : vector<2x128xf32>
    %256 = math.exp %255 : vector<2x128xf32>
    %cst_45 = arith.constant 1.000000e+00 : f32
    %257 = vector.broadcast %cst_45 : f32 to vector<2x128xf32>
    %258 = arith.addf %257, %256 : vector<2x128xf32>
    %259 = arith.divf %257, %258 : vector<2x128xf32>
    %260 = math.tanh %254 : vector<2x128xf32>
    %261 = vector.extract_strided_slice %259 {offsets = [0, 0], sizes = [2, 32], strides = [1, 1]} : vector<2x128xf32> to vector<2x32xf32>
    %262 = vector.extract_strided_slice %259 {offsets = [0, 32], sizes = [2, 32], strides = [1, 1]} : vector<2x128xf32> to vector<2x32xf32>
    %263 = vector.extract_strided_slice %260 {offsets = [0, 64], sizes = [2, 32], strides = [1, 1]} : vector<2x128xf32> to vector<2x32xf32>
    %264 = vector.extract_strided_slice %259 {offsets = [0, 96], sizes = [2, 32], strides = [1, 1]} : vector<2x128xf32> to vector<2x32xf32>
    %265 = arith.mulf %262, %249 : vector<2x32xf32>
    %266 = arith.mulf %261, %263 : vector<2x32xf32>
    %267 = arith.addf %265, %266 : vector<2x32xf32>
    %268 = math.tanh %267 : vector<2x32xf32>
    %269 = arith.mulf %264, %268 : vector<2x32xf32>
    %270 = vector.extract_strided_slice %158 {offsets = [12, 0], sizes = [2, 128], strides = [1, 1]} : vector<16x128xf32> to vector<2x128xf32>
    %cst_46 = arith.constant dense<0.000000e+00> : vector<2x128xf32>
    %271 = tpu.matmul %269, %159, %cst_46 {dimension_numbers = #tpu.dot_dimension_numbers<[1], [0], [0], [1], [0, 0, 1, 1], [], []>} : vector<2x32xf32>, vector<32x128xf32>, vector<2x128xf32> -> vector<2x128xf32>
    %272 = arith.addf %270, %271 : vector<2x128xf32>
    %273 = arith.negf %272 : vector<2x128xf32>
    %274 = math.exp %273 : vector<2x128xf32>
    %cst_47 = arith.constant 1.000000e+00 : f32
    %275 = vector.broadcast %cst_47 : f32 to vector<2x128xf32>
    %276 = arith.addf %275, %274 : vector<2x128xf32>
    %277 = arith.divf %275, %276 : vector<2x128xf32>
    %278 = math.tanh %272 : vector<2x128xf32>
    %279 = vector.extract_strided_slice %277 {offsets = [0, 0], sizes = [2, 32], strides = [1, 1]} : vector<2x128xf32> to vector<2x32xf32>
    %280 = vector.extract_strided_slice %277 {offsets = [0, 32], sizes = [2, 32], strides = [1, 1]} : vector<2x128xf32> to vector<2x32xf32>
    %281 = vector.extract_strided_slice %278 {offsets = [0, 64], sizes = [2, 32], strides = [1, 1]} : vector<2x128xf32> to vector<2x32xf32>
    %282 = vector.extract_strided_slice %277 {offsets = [0, 96], sizes = [2, 32], strides = [1, 1]} : vector<2x128xf32> to vector<2x32xf32>
    %283 = arith.mulf %280, %267 : vector<2x32xf32>
    %284 = arith.mulf %279, %281 : vector<2x32xf32>
    %285 = arith.addf %283, %284 : vector<2x32xf32>
    %286 = math.tanh %285 : vector<2x32xf32>
    %287 = arith.mulf %282, %286 : vector<2x32xf32>
    %288 = vector.extract_strided_slice %158 {offsets = [14, 0], sizes = [2, 128], strides = [1, 1]} : vector<16x128xf32> to vector<2x128xf32>
    %cst_48 = arith.constant dense<0.000000e+00> : vector<2x128xf32>
    %289 = tpu.matmul %287, %159, %cst_48 {dimension_numbers = #tpu.dot_dimension_numbers<[1], [0], [0], [1], [0, 0, 1, 1], [], []>} : vector<2x32xf32>, vector<32x128xf32>, vector<2x128xf32> -> vector<2x128xf32>
    %290 = arith.addf %288, %289 : vector<2x128xf32>
    %291 = arith.negf %290 : vector<2x128xf32>
    %292 = math.exp %291 : vector<2x128xf32>
    %cst_49 = arith.constant 1.000000e+00 : f32
    %293 = vector.broadcast %cst_49 : f32 to vector<2x128xf32>
    %294 = arith.addf %293, %292 : vector<2x128xf32>
    %295 = arith.divf %293, %294 : vector<2x128xf32>
    %296 = math.tanh %290 : vector<2x128xf32>
    %297 = vector.extract_strided_slice %295 {offsets = [0, 0], sizes = [2, 32], strides = [1, 1]} : vector<2x128xf32> to vector<2x32xf32>
    %298 = vector.extract_strided_slice %295 {offsets = [0, 32], sizes = [2, 32], strides = [1, 1]} : vector<2x128xf32> to vector<2x32xf32>
    %299 = vector.extract_strided_slice %296 {offsets = [0, 64], sizes = [2, 32], strides = [1, 1]} : vector<2x128xf32> to vector<2x32xf32>
    %300 = vector.extract_strided_slice %295 {offsets = [0, 96], sizes = [2, 32], strides = [1, 1]} : vector<2x128xf32> to vector<2x32xf32>
    %301 = arith.mulf %298, %285 : vector<2x32xf32>
    %302 = arith.mulf %297, %299 : vector<2x32xf32>
    %303 = arith.addf %301, %302 : vector<2x32xf32>
    %304 = math.tanh %303 : vector<2x32xf32>
    %305 = arith.mulf %300, %304 : vector<2x32xf32>
    %c0_50 = arith.constant 0 : index
    %c0_51 = arith.constant 0 : index
    %306 = vector.load %arg7[%c0_50, %c0_51] : memref<32x4xf32, #tpu.memory_space<vmem>>, vector<32x4xf32>
    %cst_52 = arith.constant dense<0.000000e+00> : vector<2x4xf32>
    %307 = tpu.matmul %305, %306, %cst_52 {dimension_numbers = #tpu.dot_dimension_numbers<[1], [0], [0], [1], [0, 0, 1, 1], [], []>} : vector<2x32xf32>, vector<32x4xf32>, vector<2x4xf32> -> vector<2x4xf32>
    %c0_53 = arith.constant 0 : index
    %c0_54 = arith.constant 0 : index
    %308 = vector.load %arg8[%c0_53, %c0_54] : memref<1x4xf32, #tpu.memory_space<vmem>>, vector<1x4xf32>
    %309 = vector.broadcast %308 : vector<1x4xf32> to vector<2x4xf32>
    %310 = arith.addf %307, %309 : vector<2x4xf32>
    %c0_55 = arith.constant 0 : index
    %c0_56 = arith.constant 0 : index
    %311 = vector.load %arg9[%c0_55, %c0_56] : memref<2x4xf32, #tpu.memory_space<vmem>>, vector<2x4xf32>
    tpu.vector_store %arg9[%c0_55, %c0_56], %310 {strides = array<i32>} : memref<2x4xf32, #tpu.memory_space<vmem>>, vector<2x4xf32>,
    return
  }
}

</mosaic_0001>

<bundles_post_ra>
// kernel: rnn_forward.1
= control target key start
LH: loop header
LB: loop body
LE: loop exit
PB: predicated region body
PF: predicated region fallthrough
CT: control target
= control target key end

     0   :  { %14 = vsyncpa [#allocation3], 0  ;;  %s3175_s0 = inlined_call_operand.vmem [shape: f32[16,100], index: 0, kind: input, shape index: {}]   ;;  %s3176_s1 = inlined_call_operand.hbm [shape: f32[100,128], index: 1, kind: input, shape index: {}]   ;;  %s3177_s2 = inlined_call_operand.vmem [shape: f32[32,128], index: 2, kind: input, shape index: {}]   ;;  %s3178_s3 = inlined_call_operand.vmem [shape: f32[1,128], index: 3, kind: input, shape index: {}]   ;;  %s3179_s4 = inlined_call_operand.vmem [shape: f32[32,128], index: 4, kind: input, shape index: {}]   ;;  %s3180_s5 = inlined_call_operand.vmem [shape: f32[32,128], index: 5, kind: input, shape index: {}]   ;;  %s3181_s6 = inlined_call_operand.vmem [shape: f32[1,128], index: 6, kind: input, shape index: {}]   ;;  %s3182_s7 = inlined_call_operand.vmem [shape: f32[32,4], index: 7, kind: input, shape index: {}]   ;;  %s3183_s8 = inlined_call_operand.hbm [shape: f32[1,4], index: 8, kind: input, shape index: {}]   ;;  %s3184_s9 = inlined_call_operand.hbm [shape: f32[2,4], index: 9, kind: output, shape index: {}]  }
   0x1   :  { %15 = vsyncpa [#allocation6], 0 }
   0x2   :  { %16 = vsyncpa [#allocation4], 0  ;;  %s2782_s30 = smov [#allocation2]   ;;  %s2710_s13 = scalar_lea.hbm %s3176_s1, 1664 }
   0x3   :  { %s24_s10 = sshll.u32 %s2782_s30, 4  ;;  %p2711_p0 = scmp.ne.s32.totalorder %s3176_s1, %s2710_s13  ;;  %s25_s10 = int_to_ptr.vmem [resolvable:$true] %s24_s10 }
   0x4   :  { %p2714_p1 = scmp.lt.u32.totalorder %s2710_s13, %s3176_s1 }
   0x6   :  { %p2716_p2 = pnand %p2714_p1, %p2711_p0 }
   0x8   :  { %2719 = shalt.err (!%p2716_p2)
}
   0x9   :  { %s2720_s18 = scalar_lea.vmem %s25_s10, 1664  ;;  %p2725_p4 = scmp.lt.s32.totalorder %s25_s10, %s25_s10 }
   0xa   :  { %p2721_p3 = scmp.ne.s32.totalorder %s25_s10, %s2720_s18  ;;  %p2726_p5 = scmp.lt.s32.totalorder %s2720_s18, %s2720_s18 }
   0xc   :  { %p2727_p6 = por %p2726_p5, %p2725_p4 }
   0xe   :  { %p2728_p7 = pnand %p2727_p6, %p2721_p3 }
  0x10   :  { %2731 = shalt.err (!%p2728_p7)
}
  0x11   :  { %s2783_s19 = smov 128   ;;  %s2784_s20 = smov 8  }
  0x12   :  { %30 = dma.hbm_to_vmem [thread:$0]  %s3176_s1, 1664, %s25_s10, [#allocation3], %s2783_s19, %s2783_s19, %s2784_s20  }
  0x13   :  { %s2785_s23 = smov [#allocation5]   ;;  %s2732_s27 = scalar_lea.hbm %s3183_s8, 16 }
  0x14   :  { %s49_s24 = sshll.u32 %s2785_s23, 4  ;;  %p2733_p8 = scmp.ne.s32.totalorder %s3183_s8, %s2732_s27  ;;  %s50_s24 = int_to_ptr.vmem [resolvable:$true] %s49_s24 }
  0x15   :  { %p2736_p9 = scmp.lt.u32.totalorder %s2732_s27, %s3183_s8 }
  0x17   :  { %p2738_p10 = pnand %p2736_p9, %p2733_p8 }
  0x19   :  { %2741 = shalt.err (!%p2738_p10)
}
  0x1a   :  { %s2742_s12 = scalar_lea.vmem %s50_s24, 16  ;;  %s2746_s1 = scalar_lea.vmem %s50_s24, 32 }
  0x1b   :  { %p2743_p11 = scmp.ne.s32.totalorder %s50_s24, %s2742_s12  ;;  %p2747_p12 = scmp.lt.s32.totalorder %s50_s24, %s50_s24 }
  0x1c   :  { %p2748_p13 = scmp.lt.s32.totalorder %s2746_s1, %s2742_s12 }
  0x1e   :  { %p2749_p0 = por %p2748_p13, %p2747_p12 }
  0x20   :  { %p2750_p1 = pnand %p2749_p0, %p2743_p11 }
  0x22   :  { %2753 = shalt.err (!%p2750_p1)
}
  0x23   :  { %52 = dma.hbm_to_vmem [thread:$0]  %s3183_s8, 16, %s50_s24, [#allocation6]  }
  0x24   :  { %2776 = dma.done.wait [#allocation3], 1664  }
  0x25   :  { %2777 = vsyncadd [#allocation3], 4294965632 }
  0x26   :  { %2778 = dma.done.wait [#allocation6], 16  }
  0x27   :  { %2779 = vsyncadd [#allocation6], 4294967280  ;;  %v2786_v0 = vmov 0.0|0.0   ;;  %vm2787_vm0 = vmmov 0   ;;  %v2788_v1 = vmov 0.0   ;;  %v61_v2 = vld [vmem:[#allocation2] sm:$0xff] }
  0x28   :  { %2462 = vmatprep.subr.bf16.mxu1 %v2786_v0  ;;  %2248 = vmatprep.mubr.msk.f32.mxu1 %vm2787_vm0, %v2788_v1  ;;  %v62_v3 = vld [vmem:[#allocation2 + $0x8] sm:$0xff]  ;;  %v63_v4 = vld [vmem:[#allocation2 + $0x10] sm:$0xff]  ;;  %v64_v6 = vld [vmem:[#allocation2 + $0x18] sm:$0xff]  ;;  %vm81_vm1 = vcmask 818176   ;;  %vm88_vm2 = vcmask 1043456   ;;  %s2789_s25 = smov 64  }
  0x29   :  { %v2438_v5 = vpack.c.bf16 %v62_v3, %v61_v2  ;;  %v2442_v7 = vpack.c.bf16 %v64_v6, %v63_v4  ;;  %v65_v8 = vld [vmem:[#allocation2 + $0x20] sm:$0xff]  ;;  %v66_v9 = vld [vmem:[#allocation2 + $0x28] sm:$0xff]  ;;  %v169_v15 = vld [vmem:[%s3177_s2 + $0x10] sm:$0xff]  ;;  %vm171_vm3 = vcmask 261120   ;;  %vm1014_vm4 = vcmask 1041408   ;;  %s2791_s24 = smov [#allocation7]  }
  0x2a   :  { %v167_v10 = vld [vmem:[%s3177_s2] sm:$0xff]  ;;  %v168_v11 = vld [vmem:[%s3177_s2 + $0x8] sm:$0xff]  ;;  %v2446_v12 = vpack.c.bf16 %v66_v9, %v65_v8  ;;  %v170_v16 = vld [vmem:[%s3177_s2 + $0x18] sm:$0xff]  ;;  %vm1017_vm5 = vcmask 1045504   ;;  %s2056_s26 = sshll.u32 %s2791_s24, 4  ;;  %vm2048_vm6 = vcmask 25600   ;;  %s2057_s26 = int_to_ptr.vmem [resolvable:$true] %s2056_s26 }
  0x2b   :  { %2439 = vmatprep.subr.bf16.mxu0 %v2438_v5  ;;  %v2875_v13 = vpack.c.bf16 %v168_v11, %v167_v10  ;;  %v59_v14 = vld [vmem:[%s3175_s0] sm:$0xff]  ;;  %v67_v17 = vld [vmem:[#allocation2 + $0x30] sm:$0xff]  ;;  %v68_v18 = vld [vmem:[#allocation2 + $0x38] sm:$0xff]  ;;  %v2888_v19 = vpack.c.bf16 %v170_v16, %v169_v15  ;;  %p2759_p3 = scmp.lt.s32.totalorder %s2057_s26, %s2057_s26 }
  0x2c   :  { %2441 = vmatpush3.bf16.msra.mxu0 %v2438_v5  ;;  %2237 = vmatprep.mubr.msk.f32.mxu0 %vm81_vm1, %v59_v14  ;;  %v2450_v20 = vpack.c.bf16 %v68_v18, %v67_v17  ;;  %v69_v21 = vld [vmem:[#allocation2 + $0x40] sm:$0xff]  ;;  %v70_v22 = vld [vmem:[#allocation2 + $0x48] sm:$0xff]  ;;  %v71_v24 = vld [vmem:[#allocation2 + $0x50] sm:$0xff] }
  0x2d   :  { %2443 = vmatprep.subr.bf16.mxu0 %v2442_v7  ;;  %2464 = vmatpush3.bf16.msra.mxu1 %v2875_v13  ;;  %v2454_v23 = vpack.c.bf16 %v70_v22, %v69_v21  ;;  %v72_v25 = vld [vmem:[#allocation2 + $0x58] sm:$0xff]  ;;  %v73_v27 = vld [vmem:[#allocation2 + $0x60] sm:$0xf]  ;;  %v60_v28 = vld [vmem:[%s3175_s0 + $0x8] sm:$0xff] }
  0x2e   :  { %2465 = vmatprep.subr.bf16.mxu1 %v2786_v0  ;;  %v2458_v26 = vpack.c.bf16 %v72_v25, %v71_v24  ;;  %v2066_v31 = vld [vmem:[%s3178_s3] ss:$0 sm:$0xff]  ;;  %s2790_s3 = smov 32  }
  0x30   :  { %2445 = vmatpush3.bf16.msra.mxu0 %v2442_v7 }
  0x31   :  { %2447 = vmatprep.subr.bf16.mxu0 %v2446_v12  ;;  %2467 = vmatpush3.bf16.msra.mxu1 %v2888_v19 }
  0x32   :  { %2468 = vmatprep.subr.bf16.mxu1 %v2786_v0 }
  0x34   :  { %2449 = vmatpush3.bf16.msra.mxu0 %v2446_v12  ;;  %2249 = vmatmul.mubr.f32.vlgmr.msra.gmra.mrb[0].mxu1 %v2788_v1 }
  0x35   :  { %2451 = vmatprep.subr.bf16.mxu0 %v2450_v20  ;;  %2470 = vmatpush3.bf16.msra.mxu1 %v2875_v13 }
  0x36   :  { %2259 = vmatprep.mubr.msk.f32.mxu1 %vm2787_vm0, %v2788_v1  ;;  %2471 = vmatprep.subr.bf16.mxu1 %v2786_v0 }
  0x38   :  { %2453 = vmatpush3.bf16.msra.mxu0 %v2450_v20 }
  0x39   :  { %2455 = vmatprep.subr.bf16.mxu0 %v2454_v23  ;;  %2473 = vmatpush3.bf16.msra.mxu1 %v2888_v19 }
  0x3a   :  { %2474 = vmatprep.subr.bf16.mxu1 %v2786_v0 }
  0x3c   :  { %2457 = vmatpush3.bf16.msra.mxu0 %v2454_v23 }
  0x3d   :  { %2459 = vmatprep.subr.bf16.mxu0 %v2458_v26 }
  0x40   :  { %2461 = vmatpush3.bf16.msra.mxu0 %v2458_v26 }
  0x41   :  { %2235 = vmatprep.subr.msk.mxu0 %vm88_vm2, %v73_v27 }
  0x44   :  { %2236 = vmatpush3.msk.msra.mxu0 %vm88_vm2, %v73_v27 }
  0x45   :  { %2238 = vmatmul.mubr.msk.f32.vlgmr.msra.gmra.mrb[0].mxu0 %vm81_vm1, %v60_v28  ;;  %2486 = vmatprep.subr.bf16.mxu0 %v2786_v0 }
  0x46   :  { %2488 = vmatpush3.bf16.msra.mxu0 %v2875_v13  ;;  %2292 = vmatprep.mubr.msk.f32.mxu0 %vm2787_vm0, %v2788_v1 }
  0x47   :  { %2489 = vmatprep.subr.bf16.mxu0 %v2786_v0 }
  0x4a   :  { %2491 = vmatpush3.bf16.msra.mxu0 %v2888_v19 }
  0x4b   :  { %2498 = vmatprep.subr.bf16.mxu0 %v2786_v0 }
 0x107   :  { %v241_v29 = vpop.f32.mrb[0].mxu1 }
 0x108   :  { %v2250_v30 = vpop.f32.mrb[1].mxu1 }
 0x118   :  { %v2239_v32 = vpop.f32.mrb[0].mxu0 }
 0x119   :  { %v2916_v33 = vadd.f32 %v2239_v32, %v2066_v31  ;;  %v158_v34 = vpop.f32.mrb[1].mxu0 }
 0x11a   :  { %v2918_v35 = vadd.f32 %v2066_v31, %v158_v34 }
 0x11c   :  { %v245_v36 = vadd.f32 %v241_v29, %v2918_v35 }
 0x11e   :  { %2582 = vtanh.f32 %v245_v36  ;;  %v2070_v38 = vmul.f32 -1.442695, %v245_v36 }
 0x120   :  { %2584 = vpow2.f32 %v2070_v38 }
 0x128   :  { %v2583_v37 = vpop.eup %2582 }
 0x129   :  { %255 = vrot.lane.b32.xlu0 %v2583_v37, %s2789_s25 }
 0x12a   :  { %v2585_v39 = vpop.eup %2584 }
 0x12b   :  { %v249_v40 = vadd.f32 1.0, %v2585_v39 }
 0x12d   :  { %2586 = vrcp.f32 %v249_v40 }
 0x137   :  { %v2587_v41 = vpop.eup %2586 }
 0x138   :  { %v253_v44 = vmul.f32 0.0, %v2587_v41 }
 0x19b   :  { %v256_v42 = vpop.permute.xlu0 %255 }
 0x19c   :  { %v258_v43 = vmul.f32 %v2587_v41, %v256_v42 }
 0x19e   :  { %260 = vrot.lane.b32.xlu0 %v258_v43, %s2790_s3 }
 0x210   :  { %v261_v45 = vpop.permute.xlu0 %260 }
 0x211   :  { %v263_v46 = vadd.f32 %v261_v45, %v253_v44 }
 0x213   :  { %2588 = vtanh.f32 %v263_v46  ;;  %v357_v62 = vrot.slane %v263_v46, 6 }
 0x21d   :  { %v2589_v47 = vpop.eup %2588 }
 0x21e   :  { %266 = vrot.lane.b32.xlu1 %v2589_v47, %s2789_s25 }
 0x290   :  { %v267_v48 = vpop.permute.xlu1 %266 }
 0x291   :  { %v2924_v49 = vmul.f32 %v2587_v41, %v267_v48 }
 0x293   :  { %271 = vrot.lane.b32.xlu1 %v2924_v49, %s2790_s3 }
 0x305   :  { %v272_v50 = vpop.permute.xlu1 %271 }
 0x306   :  { %2260 = vmatmul.mubr.msk.f32.vlgmr.msra.gmra.mrb[2].mxu1 %vm171_vm3, %v272_v50 }
 0x307   :  { %2476 = vmatpush3.bf16.msra.mxu1 %v2875_v13  ;;  %2270 = vmatprep.mubr.msk.f32.mxu1 %vm2787_vm0, %v2788_v1 }
 0x308   :  { %2477 = vmatprep.subr.bf16.mxu1 %v2786_v0 }
 0x30b   :  { %2479 = vmatpush3.bf16.msra.mxu1 %v2888_v19 }
 0x30c   :  { %2480 = vmatprep.subr.bf16.mxu1 %v2786_v0 }
 0x3d9   :  { %v341_v51 = vpop.f32.mrb[2].mxu1 }
 0x3da   :  { %v346_v52 = vrot.slane %v341_v51, 6  ;;  %v2261_v53 = vpop.f32.mrb[3].mxu1 }
 0x3dc   :  { %v348_v54 = vadd.f32 %v346_v52, %v2918_v35 }
 0x3de   :  { %2590 = vtanh.f32 %v348_v54  ;;  %v2072_v56 = vmul.f32 -1.442695, %v348_v54 }
 0x3e0   :  { %2592 = vpow2.f32 %v2072_v56 }
 0x3e8   :  { %v2591_v55 = vpop.eup %2590 }
 0x3e9   :  { %361 = vrot.lane.b32.xlu0 %v2591_v55, %s2789_s25 }
 0x3ea   :  { %v2593_v57 = vpop.eup %2592 }
 0x3eb   :  { %v352_v58 = vadd.f32 1.0, %v2593_v57 }
 0x3ed   :  { %2594 = vrcp.f32 %v352_v58 }
 0x3f7   :  { %v2595_v59 = vpop.eup %2594 }
 0x3f8   :  { %v359_v63 = vmul.f32 %v2595_v59, %v357_v62 }
 0x45b   :  { %v362_v60 = vpop.permute.xlu0 %361 }
 0x45c   :  { %v364_v61 = vmul.f32 %v2595_v59, %v362_v60 }
 0x45e   :  { %366 = vrot.lane.b32.xlu1 %v364_v61, %s2790_s3 }
 0x4d0   :  { %v367_v2 = vpop.permute.xlu1 %366 }
 0x4d1   :  { %v369_v3 = vadd.f32 %v367_v2, %v359_v63 }
 0x4d3   :  { %2596 = vtanh.f32 %v369_v3  ;;  %v464_v22 = vrot.slane %v369_v3, 6 }
 0x4dd   :  { %v2597_v4 = vpop.eup %2596 }
 0x4de   :  { %372 = vrot.lane.b32.xlu0 %v2597_v4, %s2789_s25 }
 0x550   :  { %v373_v5 = vpop.permute.xlu0 %372 }
 0x551   :  { %v375_v6 = vmul.f32 %v2595_v59, %v373_v5 }
 0x553   :  { %v377_v7 = vrot.slane %v375_v6, 2  ;;  %v1015_v29 = vsel %vm1014_vm4, %v2924_v49, %v375_v6 }
 0x555   :  { %378 = vrot.lane.b32.xlu1 %v377_v7, %s2790_s3 }
 0x5c7   :  { %v379_v8 = vpop.permute.xlu1 %378 }
 0x5c8   :  { %2271 = vmatmul.mubr.msk.f32.vlgmr.msra.gmra.mrb[4].mxu1 %vm171_vm3, %v379_v8 }
 0x5c9   :  { %2482 = vmatpush3.bf16.msra.mxu1 %v2875_v13  ;;  %2281 = vmatprep.mubr.msk.f32.mxu1 %vm2787_vm0, %v2788_v1 }
 0x5ca   :  { %2483 = vmatprep.subr.bf16.mxu1 %v2786_v0 }
 0x5cd   :  { %2485 = vmatpush3.bf16.msra.mxu1 %v2888_v19 }
 0x5ce   :  { %2492 = vmatprep.subr.bf16.mxu1 %v2786_v0 }
 0x69b   :  { %v448_v9 = vpop.f32.mrb[4].mxu1 }
 0x69c   :  { %v453_v10 = vrot.slane %v448_v9, 4  ;;  %v2272_v11 = vpop.f32.mrb[5].mxu1 }
 0x69e   :  { %v455_v12 = vadd.f32 %v453_v10, %v2918_v35 }
 0x6a0   :  { %2598 = vtanh.f32 %v455_v12  ;;  %v2074_v15 = vmul.f32 -1.442695, %v455_v12 }
 0x6a2   :  { %2600 = vpow2.f32 %v2074_v15 }
 0x6aa   :  { %v2599_v14 = vpop.eup %2598 }
 0x6ab   :  { %468 = vrot.lane.b32.xlu0 %v2599_v14, %s2789_s25 }
 0x6ac   :  { %v2601_v16 = vpop.eup %2600 }
 0x6ad   :  { %v459_v17 = vadd.f32 1.0, %v2601_v16 }
 0x6af   :  { %2602 = vrcp.f32 %v459_v17 }
 0x6b9   :  { %v2603_v18 = vpop.eup %2602 }
 0x6ba   :  { %v466_v23 = vmul.f32 %v2603_v18, %v464_v22 }
 0x71d   :  { %v469_v20 = vpop.permute.xlu0 %468 }
 0x71e   :  { %v471_v21 = vmul.f32 %v2603_v18, %v469_v20 }
 0x720   :  { %473 = vrot.lane.b32.xlu1 %v471_v21, %s2790_s3 }
 0x792   :  { %v474_v24 = vpop.permute.xlu1 %473 }
 0x793   :  { %v476_v25 = vadd.f32 %v474_v24, %v466_v23 }
 0x795   :  { %2604 = vtanh.f32 %v476_v25  ;;  %v571_v46 = vrot.slane %v476_v25, 6 }
 0x79f   :  { %v2605_v26 = vpop.eup %2604 }
 0x7a0   :  { %479 = vrot.lane.b32.xlu0 %v2605_v26, %s2789_s25 }
 0x812   :  { %v480_v27 = vpop.permute.xlu0 %479 }
 0x813   :  { %v482_v28 = vmul.f32 %v2603_v18, %v480_v27 }
 0x815   :  { %v484_v30 = vrot.slane %v482_v28, 4  ;;  %v1016_v31 = vsel %vm88_vm2, %v1015_v29, %v482_v28 }
 0x817   :  { %485 = vrot.lane.b32.xlu1 %v484_v30, %s2790_s3 }
 0x889   :  { %v486_v32 = vpop.permute.xlu1 %485 }
 0x88a   :  { %2282 = vmatmul.mubr.msk.f32.vlgmr.msra.gmra.mrb[6].mxu1 %vm171_vm3, %v486_v32 }
 0x88b   :  { %2494 = vmatpush3.bf16.msra.mxu1 %v2875_v13  ;;  %2303 = vmatprep.mubr.msk.f32.mxu1 %vm2787_vm0, %v2788_v1 }
 0x88c   :  { %2495 = vmatprep.subr.bf16.mxu1 %v2786_v0 }
 0x88f   :  { %2497 = vmatpush3.bf16.msra.mxu1 %v2888_v19 }
 0x890   :  { %2504 = vmatprep.subr.bf16.mxu1 %v2786_v0 }
 0x95d   :  { %v555_v34 = vpop.f32.mrb[6].mxu1 }
 0x95e   :  { %v560_v36 = vrot.slane %v555_v34, 2  ;;  %v2283_v37 = vpop.f32.mrb[7].mxu1 }
 0x960   :  { %v562_v38 = vadd.f32 %v560_v36, %v2918_v35 }
 0x962   :  { %2606 = vtanh.f32 %v562_v38  ;;  %v2076_v40 = vmul.f32 -1.442695, %v562_v38 }
 0x964   :  { %2608 = vpow2.f32 %v2076_v40 }
 0x96c   :  { %v2607_v39 = vpop.eup %2606 }
 0x96d   :  { %575 = vrot.lane.b32.xlu0 %v2607_v39, %s2789_s25 }
 0x96e   :  { %v2609_v41 = vpop.eup %2608 }
 0x96f   :  { %v566_v42 = vadd.f32 1.0, %v2609_v41 }
 0x971   :  { %2610 = vrcp.f32 %v566_v42 }
 0x97b   :  { %v2611_v43 = vpop.eup %2610 }
 0x97c   :  { %v573_v47 = vmul.f32 %v2611_v43, %v571_v46 }
 0x9df   :  { %v576_v44 = vpop.permute.xlu0 %575 }
 0x9e0   :  { %v578_v45 = vmul.f32 %v2611_v43, %v576_v44 }
 0x9e2   :  { %580 = vrot.lane.b32.xlu1 %v578_v45, %s2790_s3 }
 0xa54   :  { %v581_v48 = vpop.permute.xlu1 %580 }
 0xa55   :  { %v583_v49 = vadd.f32 %v581_v48, %v573_v47 }
 0xa57   :  { %2612 = vtanh.f32 %v583_v49  ;;  %v675_v3 = vrot.slane %v583_v49, 6 }
 0xa61   :  { %v2613_v35 = vpop.eup %2612 }
 0xa62   :  { %586 = vrot.lane.b32.xlu0 %v2613_v35, %s2789_s25 }
 0xad4   :  { %v587_v50 = vpop.permute.xlu0 %586 }
 0xad5   :  { %v589_v51 = vmul.f32 %v2611_v43, %v587_v50 }
 0xad7   :  { %v591_v52 = vrot.slane %v589_v51, 6  ;;  %v2967_v53 = vsel %vm1017_vm5, %v1016_v31, %v589_v51 }
 0xad9   :  { %592 = vrot.lane.b32.xlu1 %v591_v52, %s2790_s3 }
 0xb4b   :  { %v593_v54 = vpop.permute.xlu1 %592 }
 0xb4c   :  { %2293 = vmatmul.mubr.msk.f32.vlgmr.msra.gmra.mrb[2].mxu0 %vm171_vm3, %v593_v54 }
 0xb4d   :  { %2500 = vmatpush3.bf16.msra.mxu0 %v2875_v13  ;;  %2314 = vmatprep.mubr.msk.f32.mxu0 %vm2787_vm0, %v2788_v1 }
 0xb4e   :  { %2501 = vmatprep.subr.bf16.mxu0 %v2786_v0 }
 0xb51   :  { %2503 = vmatpush3.bf16.msra.mxu0 %v2888_v19 }
 0xc1f   :  { %v662_v55 = vpop.f32.mrb[2].mxu0 }
 0xc20   :  { %v666_v56 = vadd.f32 %v662_v55, %v2916_v33  ;;  %v2294_v57 = vpop.f32.mrb[3].mxu0 }
 0xc22   :  { %2614 = vtanh.f32 %v666_v56  ;;  %v2078_v59 = vmul.f32 -1.442695, %v666_v56 }
 0xc24   :  { %2616 = vpow2.f32 %v2078_v59 }
 0xc2c   :  { %v2615_v58 = vpop.eup %2614 }
 0xc2d   :  { %679 = vrot.lane.b32.xlu0 %v2615_v58, %s2789_s25 }
 0xc2e   :  { %v2617_v60 = vpop.eup %2616 }
 0xc2f   :  { %v670_v61 = vadd.f32 1.0, %v2617_v60 }
 0xc31   :  { %2618 = vrcp.f32 %v670_v61 }
 0xc3b   :  { %v2619_v62 = vpop.eup %2618 }
 0xc3c   :  { %v677_v4 = vmul.f32 %v2619_v62, %v675_v3 }
 0xc9f   :  { %v680_v63 = vpop.permute.xlu0 %679 }
 0xca0   :  { %v682_v2 = vmul.f32 %v2619_v62, %v680_v63 }
 0xca2   :  { %684 = vrot.lane.b32.xlu1 %v682_v2, %s2790_s3 }
 0xd14   :  { %v685_v5 = vpop.permute.xlu1 %684 }
 0xd15   :  { %v687_v6 = vadd.f32 %v685_v5, %v677_v4 }
 0xd17   :  { %2620 = vtanh.f32 %v687_v6 }
 0xd21   :  { %v2621_v7 = vpop.eup %2620 }
 0xd22   :  { %690 = vrot.lane.b32.xlu0 %v2621_v7, %s2789_s25 }
 0xd94   :  { %v691_v8 = vpop.permute.xlu0 %690 }
 0xd95   :  { %v2980_v9 = vmul.f32 %v2619_v62, %v691_v8  ;;  %v1022_v8 = vld [vmem:[%s3179_s4] sm:$0xff] }
 0xd97   :  { %695 = vrot.lane.b32.xlu1 %v2980_v9, %s2790_s3 }
 0xe09   :  { %v696_v10 = vpop.permute.xlu1 %695 }
 0xe0a   :  { %2304 = vmatmul.mubr.msk.f32.vlgmr.msra.gmra.mrb[8].mxu1 %vm171_vm3, %v696_v10  ;;  %v1118_v10 = vld [vmem:[%s3180_s5] sm:$0xff] }
 0xe0b   :  { %2506 = vmatpush3.bf16.msra.mxu1 %v2875_v13  ;;  %2325 = vmatprep.mubr.msk.f32.mxu1 %vm2787_vm0, %v2788_v1 }
 0xe0c   :  { %2507 = vmatprep.subr.bf16.mxu1 %v2786_v0 }
 0xe0f   :  { %2509 = vmatpush3.bf16.msra.mxu1 %v2888_v19  ;;  %v781_v19 = vrot.slane %v687_v6, 6 }
 0xe10   :  { %2518 = vmatprep.subr.bf16.mxu1 %v2786_v0 }
 0xedd   :  { %v765_v11 = vpop.f32.mrb[8].mxu1 }
 0xede   :  { %v770_v12 = vrot.slane %v765_v11, 6  ;;  %v2305_v14 = vpop.f32.mrb[9].mxu1  ;;  %v1119_v11 = vld [vmem:[%s3180_s5 + $0x8] sm:$0xff] }
 0xedf   :  { %v1025_v14 = vld [vmem:[%s3179_s4 + $0x18] sm:$0xff] }
 0xee0   :  { %v772_v15 = vadd.f32 %v770_v12, %v2916_v33  ;;  %v1024_v12 = vld [vmem:[%s3179_s4 + $0x10] sm:$0xff] }
 0xee2   :  { %2622 = vtanh.f32 %v772_v15  ;;  %v2080_v17 = vmul.f32 -1.442695, %v772_v15  ;;  %v3032_v15 = vpack.c.bf16 %v1119_v11, %v1118_v10 }
 0xee4   :  { %2624 = vpow2.f32 %v2080_v17  ;;  %v1120_v17 = vld [vmem:[%s3180_s5 + $0x10] sm:$0xff] }
 0xeec   :  { %v2623_v16 = vpop.eup %2622 }
 0xeed   :  { %785 = vrot.lane.b32.xlu0 %v2623_v16, %s2789_s25  ;;  %v2514_v16 = vpack.c.bf16 %v1025_v14, %v1024_v12 }
 0xeee   :  { %v2625_v13 = vpop.eup %2624 }
 0xeef   :  { %v776_v18 = vadd.f32 1.0, %v2625_v13  ;;  %v1121_v13 = vld [vmem:[%s3180_s5 + $0x18] sm:$0xff] }
 0xef1   :  { %2626 = vrcp.f32 %v776_v18  ;;  %v3041_v18 = vpack.c.bf16 %v1121_v13, %v1120_v17 }
 0xefb   :  { %v2627_v20 = vpop.eup %2626 }
 0xefc   :  { %v783_v23 = vmul.f32 %v2627_v20, %v781_v19 }
 0xf5f   :  { %v786_v21 = vpop.permute.xlu0 %785 }
 0xf60   :  { %v788_v22 = vmul.f32 %v2627_v20, %v786_v21 }
 0xf62   :  { %790 = vrot.lane.b32.xlu1 %v788_v22, %s2790_s3 }
 0xfd4   :  { %v791_v24 = vpop.permute.xlu1 %790 }
 0xfd5   :  { %v793_v25 = vadd.f32 %v791_v24, %v783_v23 }
 0xfd7   :  { %2628 = vtanh.f32 %v793_v25  ;;  %v888_v44 = vrot.slane %v793_v25, 6 }
 0xfe1   :  { %v2629_v26 = vpop.eup %2628 }
 0xfe2   :  { %796 = vrot.lane.b32.xlu0 %v2629_v26, %s2789_s25  ;;  %v2085_v26 = vld [vmem:[%s3181_s6] ss:$0 sm:$0xff] }
0x1054   :  { %v797_v27 = vpop.permute.xlu0 %796 }
0x1055   :  { %v799_v28 = vmul.f32 %v2627_v20, %v797_v27 }
0x1057   :  { %v801_v29 = vrot.slane %v799_v28, 2  ;;  %v1019_v50 = vsel %vm1014_vm4, %v2980_v9, %v799_v28  ;;  %v1023_v9 = vld [vmem:[%s3179_s4 + $0x8] sm:$0xff] }
0x1059   :  { %802 = vrot.lane.b32.xlu1 %v801_v29, %s2790_s3 }
0x10cb   :  { %v803_v30 = vpop.permute.xlu1 %802 }
0x10cc   :  { %2315 = vmatmul.mubr.msk.f32.vlgmr.msra.gmra.mrb[4].mxu0 %vm171_vm3, %v803_v30 }
0x119f   :  { %v872_v31 = vpop.f32.mrb[4].mxu0 }
0x11a0   :  { %v877_v32 = vrot.slane %v872_v31, 4  ;;  %v2316_v34 = vpop.f32.mrb[5].mxu0 }
0x11a2   :  { %v879_v36 = vadd.f32 %v877_v32, %v2916_v33 }
0x11a4   :  { %2630 = vtanh.f32 %v879_v36  ;;  %v2082_v38 = vmul.f32 -1.442695, %v879_v36 }
0x11a6   :  { %2632 = vpow2.f32 %v2082_v38 }
0x11ae   :  { %v2631_v37 = vpop.eup %2630 }
0x11af   :  { %892 = vrot.lane.b32.xlu0 %v2631_v37, %s2789_s25 }
0x11b0   :  { %v2633_v39 = vpop.eup %2632 }
0x11b1   :  { %v883_v40 = vadd.f32 1.0, %v2633_v39 }
0x11b3   :  { %2634 = vrcp.f32 %v883_v40 }
0x11bd   :  { %v2635_v41 = vpop.eup %2634 }
0x11be   :  { %v890_v45 = vmul.f32 %v2635_v41, %v888_v44 }
0x1221   :  { %v893_v42 = vpop.permute.xlu0 %892 }
0x1222   :  { %v895_v43 = vmul.f32 %v2635_v41, %v893_v42 }
0x1224   :  { %897 = vrot.lane.b32.xlu1 %v895_v43, %s2790_s3 }
0x1296   :  { %v898_v46 = vpop.permute.xlu1 %897 }
0x1297   :  { %v900_v47 = vadd.f32 %v898_v46, %v890_v45 }
0x1299   :  { %2636 = vtanh.f32 %v900_v47  ;;  %v995_v4 = vrot.slane %v900_v47, 6 }
0x12a3   :  { %v2637_v48 = vpop.eup %2636 }
0x12a4   :  { %903 = vrot.lane.b32.xlu0 %v2637_v48, %s2789_s25 }
0x1316   :  { %v904_v49 = vpop.permute.xlu0 %903 }
0x1317   :  { %v906_v35 = vmul.f32 %v2635_v41, %v904_v49 }
0x1319   :  { %v908_v51 = vrot.slane %v906_v35, 4  ;;  %v1020_v52 = vsel %vm88_vm2, %v1019_v50, %v906_v35 }
0x131b   :  { %909 = vrot.lane.b32.xlu1 %v908_v51, %s2790_s3 }
0x138d   :  { %v910_v54 = vpop.permute.xlu1 %909 }
0x138e   :  { %2326 = vmatmul.mubr.msk.f32.vlgmr.msra.gmra.mrb[10].mxu1 %vm171_vm3, %v910_v54 }
0x138f   :  { %2347 = vmatprep.mubr.msk.f32.mxu1 %vm2787_vm0, %v2788_v1  ;;  %2520 = vmatpush3.bf16.msra.mxu1 %v3032_v15 }
0x1390   :  { %2521 = vmatprep.subr.bf16.mxu1 %v2786_v0 }
0x1393   :  { %2523 = vmatpush3.bf16.msra.mxu1 %v3041_v18 }
0x1394   :  { %2530 = vmatprep.subr.bf16.mxu1 %v2786_v0 }
0x1396   :  { %2348 = vmatmul.mubr.f32.vlgmr.msra.gmra.mrb[12].mxu1 %v2788_v1 }
0x1397   :  { %2532 = vmatpush3.bf16.msra.mxu1 %v3032_v15  ;;  %2369 = vmatprep.mubr.msk.f32.mxu1 %vm2787_vm0, %v2788_v1 }
0x1398   :  { %2533 = vmatprep.subr.bf16.mxu1 %v2786_v0 }
0x139b   :  { %2535 = vmatpush3.bf16.msra.mxu1 %v3041_v18 }
0x139c   :  { %2542 = vmatprep.subr.bf16.mxu1 %v2786_v0 }
0x1461   :  { %v979_v55 = vpop.f32.mrb[10].mxu1 }
0x1462   :  { %v984_v56 = vrot.slane %v979_v55, 2  ;;  %v2327_v57 = vpop.f32.mrb[11].mxu1 }
0x1464   :  { %v986_v58 = vadd.f32 %v984_v56, %v2916_v33 }
0x1466   :  { %2638 = vtanh.f32 %v986_v58  ;;  %v2084_v60 = vmul.f32 -1.442695, %v986_v58 }
0x1468   :  { %2640 = vpow2.f32 %v2084_v60 }
0x1469   :  { %v1188_v24 = vpop.f32.mrb[12].mxu1 }
0x146a   :  { %v2349_v25 = vpop.f32.mrb[13].mxu1 }
0x1470   :  { %v2639_v59 = vpop.eup %2638 }
0x1471   :  { %999 = vrot.lane.b32.xlu0 %v2639_v59, %s2789_s25 }
0x1472   :  { %v2641_v61 = vpop.eup %2640 }
0x1473   :  { %v990_v62 = vadd.f32 1.0, %v2641_v61 }
0x1475   :  { %2642 = vrcp.f32 %v990_v62 }
0x147f   :  { %v2643_v63 = vpop.eup %2642 }
0x1480   :  { %v997_v5 = vmul.f32 %v2643_v63, %v995_v4 }
0x14e3   :  { %v1000_v2 = vpop.permute.xlu0 %999 }
0x14e4   :  { %v1002_v3 = vmul.f32 %v2643_v63, %v1000_v2 }
0x14e6   :  { %1004 = vrot.lane.b32.xlu1 %v1002_v3, %s2790_s3 }
0x14ea   :  { %1035 = vrot.lane.b32.xlu1 %v2967_v53, %s2790_s3  ;;  %v2510_v53 = vpack.c.bf16 %v1023_v9, %v1022_v8 }
0x14ec   :  { %2511 = vmatprep.subr.bf16.mxu0 %v2510_v53 }
0x14ed   :  { %2513 = vmatpush3.bf16.msra.mxu0 %v2510_v53 }
0x14ee   :  { %2515 = vmatprep.subr.bf16.mxu0 %v2514_v16 }
0x14f1   :  { %2517 = vmatpush3.bf16.msra.mxu0 %v2514_v16 }
0x14f2   :  { %2524 = vmatprep.subr.bf16.mxu0 %v2786_v0 }
0x1558   :  { %v1005_v33 = vpop.permute.xlu1 %1004 }
0x1559   :  { %v1007_v6 = vadd.f32 %v1005_v33, %v997_v5 }
0x155b   :  { %2644 = vtanh.f32 %v1007_v6 }
0x155c   :  { %v1036_v7 = vpop.permute.xlu1 %1035 }
0x155d   :  { %2336 = vmatprep.mubr.msk.f32.mxu0 %vm171_vm3, %v1036_v7 }
0x1565   :  { %v2645_v20 = vpop.eup %2644 }
0x1566   :  { %1010 = vrot.lane.b32.xlu0 %v2645_v20, %s2789_s25 }
0x15d8   :  { %v1011_v21 = vpop.permute.xlu0 %1010 }
0x15d9   :  { %v1013_v22 = vmul.f32 %v2643_v63, %v1011_v21 }
0x15db   :  { %v1021_v19 = vsel %vm1017_vm5, %v1020_v52, %v1013_v22 }
0x15dc   :  { %1037 = vrot.lane.b32.xlu0 %v1021_v19, %s2790_s3 }
0x164e   :  { %v1038_v23 = vpop.permute.xlu0 %1037 }
0x164f   :  { %2337 = vmatmul.mubr.msk.f32.vlgmr.msra.gmra.mrb[6].mxu0 %vm171_vm3, %v1038_v23 }
0x1650   :  { %2526 = vmatpush3.bf16.msra.mxu0 %v3032_v15  ;;  %2358 = vmatprep.mubr.msk.f32.mxu0 %vm2787_vm0, %v2788_v1 }
0x1651   :  { %2527 = vmatprep.subr.bf16.mxu0 %v2786_v0 }
0x1654   :  { %2529 = vmatpush3.bf16.msra.mxu0 %v3041_v18 }
0x1655   :  { %2536 = vmatprep.subr.bf16.mxu0 %v2786_v0 }
0x1722   :  { %v2338_v27 = vpop.f32.mrb[6].mxu0 }
0x1723   :  { %v3067_v28 = vadd.f32 %v2338_v27, %v2085_v26  ;;  %v1109_v29 = vpop.f32.mrb[7].mxu0 }
0x1724   :  { %v3069_v30 = vadd.f32 %v2085_v26, %v1109_v29 }
0x1726   :  { %v1192_v31 = vadd.f32 %v1188_v24, %v3069_v30 }
0x1728   :  { %2646 = vtanh.f32 %v1192_v31  ;;  %v2088_v34 = vmul.f32 -1.442695, %v1192_v31 }
0x172a   :  { %2648 = vpow2.f32 %v2088_v34 }
0x1732   :  { %v2647_v32 = vpop.eup %2646 }
0x1733   :  { %1202 = vrot.lane.b32.xlu1 %v2647_v32, %s2789_s25 }
0x1734   :  { %v2649_v36 = vpop.eup %2648 }
0x1735   :  { %v1196_v37 = vadd.f32 1.0, %v2649_v36 }
0x1737   :  { %2650 = vrcp.f32 %v1196_v37 }
0x1741   :  { %v2651_v38 = vpop.eup %2650 }
0x1742   :  { %v1200_v41 = vmul.f32 0.0, %v2651_v38 }
0x17a5   :  { %v1203_v39 = vpop.permute.xlu1 %1202 }
0x17a6   :  { %v1205_v40 = vmul.f32 %v2651_v38, %v1203_v39 }
0x17a8   :  { %1207 = vrot.lane.b32.xlu0 %v1205_v40, %s2790_s3 }
0x181a   :  { %v1208_v42 = vpop.permute.xlu0 %1207 }
0x181b   :  { %v1210_v43 = vadd.f32 %v1208_v42, %v1200_v41 }
0x181d   :  { %2652 = vtanh.f32 %v1210_v43  ;;  %v1304_v59 = vrot.slane %v1210_v43, 6 }
0x1827   :  { %v2653_v44 = vpop.eup %2652 }
0x1828   :  { %1213 = vrot.lane.b32.xlu1 %v2653_v44, %s2789_s25 }
0x189a   :  { %v1214_v45 = vpop.permute.xlu1 %1213 }
0x189b   :  { %v1216_v46 = vmul.f32 %v2651_v38, %v1214_v45 }
0x189d   :  { %1218 = vrot.lane.b32.xlu0 %v1216_v46, %s2790_s3 }
0x190f   :  { %v1219_v47 = vpop.permute.xlu0 %1218 }
0x1910   :  { %2359 = vmatmul.mubr.msk.f32.vlgmr.msra.gmra.mrb[8].mxu0 %vm171_vm3, %v1219_v47 }
0x1911   :  { %2538 = vmatpush3.bf16.msra.mxu0 %v3032_v15  ;;  %2380 = vmatprep.mubr.msk.f32.mxu0 %vm2787_vm0, %v2788_v1 }
0x1912   :  { %2539 = vmatprep.subr.bf16.mxu0 %v2786_v0 }
0x1915   :  { %2541 = vmatpush3.bf16.msra.mxu0 %v3041_v18 }
0x1916   :  { %2548 = vmatprep.subr.bf16.mxu0 %v2786_v0 }
0x19e3   :  { %v1288_v48 = vpop.f32.mrb[8].mxu0 }
0x19e4   :  { %v1293_v49 = vrot.slane %v1288_v48, 6  ;;  %v2360_v35 = vpop.f32.mrb[9].mxu0 }
0x19e6   :  { %v1295_v50 = vadd.f32 %v1293_v49, %v3069_v30 }
0x19e8   :  { %2654 = vtanh.f32 %v1295_v50  ;;  %v2090_v52 = vmul.f32 -1.442695, %v1295_v50 }
0x19ea   :  { %2656 = vpow2.f32 %v2090_v52 }
0x19f2   :  { %v2655_v51 = vpop.eup %2654 }
0x19f3   :  { %1308 = vrot.lane.b32.xlu1 %v2655_v51, %s2789_s25 }
0x19f4   :  { %v2657_v54 = vpop.eup %2656 }
0x19f5   :  { %v1299_v55 = vadd.f32 1.0, %v2657_v54 }
0x19f7   :  { %2658 = vrcp.f32 %v1299_v55 }
0x1a01   :  { %v2659_v56 = vpop.eup %2658 }
0x1a02   :  { %v1306_v60 = vmul.f32 %v2659_v56, %v1304_v59 }
0x1a65   :  { %v1309_v57 = vpop.permute.xlu1 %1308 }
0x1a66   :  { %v1311_v58 = vmul.f32 %v2659_v56, %v1309_v57 }
0x1a68   :  { %1313 = vrot.lane.b32.xlu0 %v1311_v58, %s2790_s3 }
0x1ada   :  { %v1314_v61 = vpop.permute.xlu0 %1313 }
0x1adb   :  { %v1316_v62 = vadd.f32 %v1314_v61, %v1306_v60 }
0x1add   :  { %2660 = vtanh.f32 %v1316_v62  ;;  %v1411_v17 = vrot.slane %v1316_v62, 6 }
0x1ae7   :  { %v2661_v63 = vpop.eup %2660 }
0x1ae8   :  { %1319 = vrot.lane.b32.xlu1 %v2661_v63, %s2789_s25 }
0x1b5a   :  { %v1320_v2 = vpop.permute.xlu1 %1319 }
0x1b5b   :  { %v1322_v3 = vmul.f32 %v2659_v56, %v1320_v2 }
0x1b5d   :  { %v1324_v4 = vrot.slane %v1322_v3, 2 }
0x1b5f   :  { %1325 = vrot.lane.b32.xlu0 %v1324_v4, %s2790_s3 }
0x1bd1   :  { %v1326_v5 = vpop.permute.xlu0 %1325 }
0x1bd2   :  { %2370 = vmatmul.mubr.msk.f32.vlgmr.msra.gmra.mrb[14].mxu1 %vm171_vm3, %v1326_v5 }
0x1bd3   :  { %2544 = vmatpush3.bf16.msra.mxu1 %v3032_v15  ;;  %2391 = vmatprep.mubr.msk.f32.mxu1 %vm2787_vm0, %v2788_v1 }
0x1bd4   :  { %2545 = vmatprep.subr.bf16.mxu1 %v2786_v0 }
0x1bd7   :  { %2547 = vmatpush3.bf16.msra.mxu1 %v3041_v18 }
0x1bd8   :  { %2554 = vmatprep.subr.bf16.mxu1 %v2786_v0 }
0x1ca5   :  { %v1395_v33 = vpop.f32.mrb[14].mxu1 }
0x1ca6   :  { %v1400_v6 = vrot.slane %v1395_v33, 4  ;;  %v2371_v7 = vpop.f32.mrb[15].mxu1 }
0x1ca8   :  { %v1402_v8 = vadd.f32 %v1400_v6, %v3069_v30 }
0x1caa   :  { %2662 = vtanh.f32 %v1402_v8  ;;  %v2092_v10 = vmul.f32 -1.442695, %v1402_v8 }
0x1cac   :  { %2664 = vpow2.f32 %v2092_v10 }
0x1cb4   :  { %v2663_v9 = vpop.eup %2662 }
0x1cb5   :  { %1415 = vrot.lane.b32.xlu1 %v2663_v9, %s2789_s25 }
0x1cb6   :  { %v2665_v53 = vpop.eup %2664 }
0x1cb7   :  { %v1406_v11 = vadd.f32 1.0, %v2665_v53 }
0x1cb9   :  { %2666 = vrcp.f32 %v1406_v11 }
0x1cc3   :  { %v2667_v12 = vpop.eup %2666 }
0x1cc4   :  { %v1413_v13 = vmul.f32 %v2667_v12, %v1411_v17 }
0x1d27   :  { %v1416_v14 = vpop.permute.xlu1 %1415 }
0x1d28   :  { %v1418_v16 = vmul.f32 %v2667_v12, %v1416_v14 }
0x1d2a   :  { %1420 = vrot.lane.b32.xlu0 %v1418_v16, %s2790_s3 }
0x1d9c   :  { %v1421_v20 = vpop.permute.xlu0 %1420 }
0x1d9d   :  { %v1423_v21 = vadd.f32 %v1421_v20, %v1413_v13 }
0x1d9f   :  { %2668 = vtanh.f32 %v1423_v21  ;;  %v1518_v41 = vrot.slane %v1423_v21, 6 }
0x1da9   :  { %v2669_v22 = vpop.eup %2668 }
0x1daa   :  { %1426 = vrot.lane.b32.xlu1 %v2669_v22, %s2789_s25 }
0x1e1c   :  { %v1427_v19 = vpop.permute.xlu1 %1426 }
0x1e1d   :  { %v1429_v23 = vmul.f32 %v2667_v12, %v1427_v19 }
0x1e1f   :  { %v1431_v24 = vrot.slane %v1429_v23, 4 }
0x1e21   :  { %1432 = vrot.lane.b32.xlu0 %v1431_v24, %s2790_s3 }
0x1e93   :  { %v1433_v25 = vpop.permute.xlu0 %1432 }
0x1e94   :  { %2381 = vmatmul.mubr.msk.f32.vlgmr.msra.gmra.mrb[10].mxu0 %vm171_vm3, %v1433_v25 }
0x1e95   :  { %2550 = vmatpush3.bf16.msra.mxu0 %v3032_v15  ;;  %2402 = vmatprep.mubr.msk.f32.mxu0 %vm2787_vm0, %v2788_v1 }
0x1e96   :  { %2551 = vmatprep.subr.bf16.mxu0 %v2786_v0 }
0x1e99   :  { %2553 = vmatpush3.bf16.msra.mxu0 %v3041_v18 }
0x1e9a   :  { %2560 = vmatprep.subr.bf16.mxu0 %v2786_v0 }
0x1f67   :  { %v1502_v26 = vpop.f32.mrb[10].mxu0 }
0x1f68   :  { %v1507_v27 = vrot.slane %v1502_v26, 2  ;;  %v2382_v29 = vpop.f32.mrb[11].mxu0 }
0x1f6a   :  { %v1509_v31 = vadd.f32 %v1507_v27, %v3069_v30 }
0x1f6c   :  { %2670 = vtanh.f32 %v1509_v31  ;;  %v2094_v34 = vmul.f32 -1.442695, %v1509_v31 }
0x1f6e   :  { %2672 = vpow2.f32 %v2094_v34 }
0x1f76   :  { %v2671_v32 = vpop.eup %2670 }
0x1f77   :  { %1522 = vrot.lane.b32.xlu1 %v2671_v32, %s2789_s25 }
0x1f78   :  { %v2673_v36 = vpop.eup %2672 }
0x1f79   :  { %v1513_v37 = vadd.f32 1.0, %v2673_v36 }
0x1f7b   :  { %2674 = vrcp.f32 %v1513_v37 }
0x1f85   :  { %v2675_v38 = vpop.eup %2674 }
0x1f86   :  { %v1520_v42 = vmul.f32 %v2675_v38, %v1518_v41 }
0x1fe9   :  { %v1523_v39 = vpop.permute.xlu1 %1522 }
0x1fea   :  { %v1525_v40 = vmul.f32 %v2675_v38, %v1523_v39 }
0x1fec   :  { %1527 = vrot.lane.b32.xlu0 %v1525_v40, %s2790_s3 }
0x205e   :  { %v1528_v43 = vpop.permute.xlu0 %1527 }
0x205f   :  { %v1530_v44 = vadd.f32 %v1528_v43, %v1520_v42 }
0x2061   :  { %2676 = vtanh.f32 %v1530_v44  ;;  %v1622_v59 = vrot.slane %v1530_v44, 6 }
0x206b   :  { %v2677_v30 = vpop.eup %2676 }
0x206c   :  { %1533 = vrot.lane.b32.xlu1 %v2677_v30, %s2789_s25 }
0x20de   :  { %v1534_v45 = vpop.permute.xlu1 %1533 }
0x20df   :  { %v1536_v46 = vmul.f32 %v2675_v38, %v1534_v45 }
0x20e1   :  { %v1538_v47 = vrot.slane %v1536_v46, 6 }
0x20e3   :  { %1539 = vrot.lane.b32.xlu0 %v1538_v47, %s2790_s3 }
0x2155   :  { %v1540_v48 = vpop.permute.xlu0 %1539 }
0x2156   :  { %2392 = vmatmul.mubr.msk.f32.vlgmr.msra.gmra.mrb[16].mxu1 %vm171_vm3, %v1540_v48 }
0x2157   :  { %2556 = vmatpush3.bf16.msra.mxu1 %v3032_v15  ;;  %2413 = vmatprep.mubr.msk.f32.mxu1 %vm2787_vm0, %v2788_v1 }
0x2158   :  { %2557 = vmatprep.subr.bf16.mxu1 %v2786_v0 }
0x215b   :  { %2559 = vmatpush3.bf16.msra.mxu1 %v3041_v18 }
0x215c   :  { %2566 = vmatprep.subr.bf16.mxu1 %v2786_v0 }
0x2229   :  { %v1609_v49 = vpop.f32.mrb[16].mxu1 }
0x222a   :  { %v1613_v35 = vadd.f32 %v1609_v49, %v3067_v28  ;;  %v2393_v50 = vpop.f32.mrb[17].mxu1 }
0x222c   :  { %2678 = vtanh.f32 %v1613_v35  ;;  %v2096_v52 = vmul.f32 -1.442695, %v1613_v35 }
0x222e   :  { %2680 = vpow2.f32 %v2096_v52 }
0x2236   :  { %v2679_v51 = vpop.eup %2678 }
0x2237   :  { %1626 = vrot.lane.b32.xlu1 %v2679_v51, %s2789_s25 }
0x2238   :  { %v2681_v54 = vpop.eup %2680 }
0x2239   :  { %v1617_v55 = vadd.f32 1.0, %v2681_v54 }
0x223b   :  { %2682 = vrcp.f32 %v1617_v55 }
0x2245   :  { %v2683_v56 = vpop.eup %2682 }
0x2246   :  { %v1624_v60 = vmul.f32 %v2683_v56, %v1622_v59 }
0x22a9   :  { %v1627_v57 = vpop.permute.xlu1 %1626 }
0x22aa   :  { %v1629_v58 = vmul.f32 %v2683_v56, %v1627_v57 }
0x22ac   :  { %1631 = vrot.lane.b32.xlu0 %v1629_v58, %s2790_s3 }
0x231e   :  { %v1632_v61 = vpop.permute.xlu0 %1631 }
0x231f   :  { %v1634_v62 = vadd.f32 %v1632_v61, %v1624_v60  ;;  %v1962_v60 = vld [vmem:[%s3182_s7 + $0x8] sm:$0xff]  ;;  %v1963_v61 = vld [vmem:[%s3182_s7 + $0x10] sm:$0xff] }
0x2321   :  { %2684 = vtanh.f32 %v1634_v62 }
0x232b   :  { %v2685_v63 = vpop.eup %2684 }
0x232c   :  { %1637 = vrot.lane.b32.xlu1 %v2685_v63, %s2789_s25  ;;  %v1964_v63 = vld [vmem:[%s3182_s7 + $0x18] sm:$0xff] }
0x239e   :  { %v1638_v2 = vpop.permute.xlu1 %1637 }
0x239f   :  { %v1640_v3 = vmul.f32 %v2683_v56, %v1638_v2  ;;  %v2570_v2 = vpack.c.bf16 %v1964_v63, %v1963_v61 }
0x23a1   :  { %1642 = vrot.lane.b32.xlu0 %v1640_v3, %s2790_s3 }
0x2413   :  { %v1643_v4 = vpop.permute.xlu0 %1642 }
0x2414   :  { %2403 = vmatmul.mubr.msk.f32.vlgmr.msra.gmra.mrb[12].mxu0 %vm171_vm3, %v1643_v4 }
0x2415   :  { %2562 = vmatpush3.bf16.msra.mxu0 %v3032_v15  ;;  %2424 = vmatprep.mubr.msk.f32.mxu0 %vm2787_vm0, %v2788_v1 }
0x2416   :  { %2563 = vmatprep.subr.bf16.mxu0 %v2786_v0 }
0x2419   :  { %2565 = vmatpush3.bf16.msra.mxu0 %v3041_v18  ;;  %v1728_v18 = vrot.slane %v1634_v62, 6 }
0x24e7   :  { %v1712_v5 = vpop.f32.mrb[12].mxu0 }
0x24e8   :  { %v1717_v33 = vrot.slane %v1712_v5, 6  ;;  %v2404_v6 = vpop.f32.mrb[13].mxu0 }
0x24ea   :  { %v1719_v7 = vadd.f32 %v1717_v33, %v3067_v28 }
0x24ec   :  { %2686 = vtanh.f32 %v1719_v7  ;;  %v2098_v9 = vmul.f32 -1.442695, %v1719_v7  ;;  %v2103_v7 = vld [vmem:[#allocation5] ss:$0 sm:$0xff] }
0x24ee   :  { %2688 = vpow2.f32 %v2098_v9 }
0x24f6   :  { %v2687_v8 = vpop.eup %2686 }
0x24f7   :  { %1732 = vrot.lane.b32.xlu1 %v2687_v8, %s2789_s25 }
0x24f8   :  { %v2689_v10 = vpop.eup %2688 }
0x24f9   :  { %v1723_v15 = vadd.f32 1.0, %v2689_v10 }
0x24fb   :  { %2690 = vrcp.f32 %v1723_v15 }
0x2505   :  { %v2691_v53 = vpop.eup %2690 }
0x2506   :  { %v1730_v14 = vmul.f32 %v2691_v53, %v1728_v18 }
0x2569   :  { %v1733_v11 = vpop.permute.xlu1 %1732 }
0x256a   :  { %v1735_v12 = vmul.f32 %v2691_v53, %v1733_v11 }
0x256c   :  { %1737 = vrot.lane.b32.xlu0 %v1735_v12, %s2790_s3 }
0x25de   :  { %v1738_v16 = vpop.permute.xlu0 %1737 }
0x25df   :  { %v1740_v17 = vadd.f32 %v1738_v16, %v1730_v14 }
0x25e1   :  { %2692 = vtanh.f32 %v1740_v17 }
0x25eb   :  { %v2693_v13 = vpop.eup %2692 }
0x25ec   :  { %1743 = vrot.lane.b32.xlu1 %v2693_v13, %s2789_s25 }
0x265e   :  { %v1744_v20 = vpop.permute.xlu1 %1743 }
0x265f   :  { %v1746_v21 = vmul.f32 %v2691_v53, %v1744_v20 }
0x2661   :  { %v1748_v22 = vrot.slane %v1746_v21, 2 }
0x2663   :  { %1749 = vrot.lane.b32.xlu0 %v1748_v22, %s2790_s3 }
0x26d5   :  { %v1750_v19 = vpop.permute.xlu0 %1749 }
0x26d6   :  { %2414 = vmatmul.mubr.msk.f32.vlgmr.msra.gmra.mrb[18].mxu1 %vm171_vm3, %v1750_v19 }
0x26d7   :  { %2435 = vmatprep.mubr.msk.f32.mxu1 %vm2787_vm0, %v2788_v1  ;;  %v1835_v1 = vrot.slane %v1740_v17, 6 }
0x27a9   :  { %v1819_v23 = vpop.f32.mrb[18].mxu1 }
0x27aa   :  { %v1824_v24 = vrot.slane %v1819_v23, 4  ;;  %v2415_v25 = vpop.f32.mrb[19].mxu1 }
0x27ac   :  { %v1826_v26 = vadd.f32 %v1824_v24, %v3067_v28 }
0x27ae   :  { %2694 = vtanh.f32 %v1826_v26  ;;  %v2100_v29 = vmul.f32 -1.442695, %v1826_v26 }
0x27b0   :  { %2696 = vpow2.f32 %v2100_v29 }
0x27b8   :  { %v2695_v27 = vpop.eup %2694 }
0x27b9   :  { %1839 = vrot.lane.b32.xlu1 %v2695_v27, %s2789_s25 }
0x27ba   :  { %v2697_v31 = vpop.eup %2696 }
0x27bb   :  { %v1830_v32 = vadd.f32 1.0, %v2697_v31 }
0x27bd   :  { %2698 = vrcp.f32 %v1830_v32 }
0x27c7   :  { %v2699_v34 = vpop.eup %2698 }
0x27c8   :  { %v1837_v38 = vmul.f32 %v2699_v34, %v1835_v1 }
0x282b   :  { %v1840_v36 = vpop.permute.xlu1 %1839 }
0x282c   :  { %v1842_v37 = vmul.f32 %v2699_v34, %v1840_v36 }
0x282e   :  { %1844 = vrot.lane.b32.xlu0 %v1842_v37, %s2790_s3 }
0x28a0   :  { %v1845_v39 = vpop.permute.xlu0 %1844 }
0x28a1   :  { %v1847_v40 = vadd.f32 %v1845_v39, %v1837_v38 }
0x28a3   :  { %2700 = vtanh.f32 %v1847_v40  ;;  %v1942_v56 = vrot.slane %v1847_v40, 6 }
0x28ad   :  { %v2701_v41 = vpop.eup %2700 }
0x28ae   :  { %1850 = vrot.lane.b32.xlu1 %v2701_v41, %s2789_s25 }
0x2920   :  { %v1851_v42 = vpop.permute.xlu1 %1850 }
0x2921   :  { %v1853_v43 = vmul.f32 %v2699_v34, %v1851_v42 }
0x2923   :  { %v1855_v44 = vrot.slane %v1853_v43, 4 }
0x2925   :  { %1856 = vrot.lane.b32.xlu0 %v1855_v44, %s2790_s3 }
0x2997   :  { %v1857_v30 = vpop.permute.xlu0 %1856 }
0x2998   :  { %2425 = vmatmul.mubr.msk.f32.vlgmr.msra.gmra.mrb[14].mxu0 %vm171_vm3, %v1857_v30 }
0x2a6b   :  { %v1926_v45 = vpop.f32.mrb[14].mxu0 }
0x2a6c   :  { %v1931_v46 = vrot.slane %v1926_v45, 2  ;;  %v2426_v47 = vpop.f32.mrb[15].mxu0 }
0x2a6e   :  { %v1933_v48 = vadd.f32 %v1931_v46, %v3067_v28  ;;  %v1961_v28 = vld [vmem:[%s3182_s7] sm:$0xff]  ;;  %s2754_s7 = scalar_lea.vmem %s2057_s26, 32 }
0x2a6f   :  { %v2567_v62 = vpack.c.bf16 %v1962_v60, %v1961_v28  ;;  %p2755_p2 = scmp.ne.s32.totalorder %s2057_s26, %s2754_s7  ;;  %p2760_p4 = scmp.lt.s32.totalorder %s2754_s7, %s2754_s7 }
0x2a70   :  { %2702 = vtanh.f32 %v1933_v48  ;;  %v2102_v35 = vmul.f32 -1.442695, %v1933_v48 }
0x2a71   :  { %2568 = vmatpush3.bf16.msra.mxu1 %v2567_v62  ;;  %p2761_p5 = por %p2760_p4, %p2759_p3 }
0x2a72   :  { %2704 = vpow2.f32 %v2102_v35  ;;  %2569 = vmatprep.subr.bf16.mxu1 %v2786_v0 }
0x2a73   :  { %p2762_p6 = pnand %p2761_p5, %p2755_p2 }
0x2a75   :  { %2571 = vmatpush3.bf16.msra.mxu1 %v2570_v2 }
0x2a7a   :  { %v2703_v49 = vpop.eup %2702 }
0x2a7b   :  { %1946 = vrot.lane.b32.xlu1 %v2703_v49, %s2789_s25 }
0x2a7c   :  { %v2705_v50 = vpop.eup %2704 }
0x2a7d   :  { %v1937_v51 = vadd.f32 1.0, %v2705_v50 }
0x2a7f   :  { %2706 = vrcp.f32 %v1937_v51 }
0x2a89   :  { %v2707_v52 = vpop.eup %2706 }
0x2a8a   :  { %v1944_v57 = vmul.f32 %v2707_v52, %v1942_v56 }
0x2aed   :  { %v1947_v54 = vpop.permute.xlu1 %1946 }
0x2aee   :  { %v1949_v55 = vmul.f32 %v2707_v52, %v1947_v54 }
0x2af0   :  { %1951 = vrot.lane.b32.xlu0 %v1949_v55, %s2790_s3 }
0x2b62   :  { %v1952_v58 = vpop.permute.xlu0 %1951 }
0x2b63   :  { %v1954_v59 = vadd.f32 %v1952_v58, %v1944_v57 }
0x2b65   :  { %2708 = vtanh.f32 %v1954_v59 }
0x2b6f   :  { %v2709_v3 = vpop.eup %2708 }
0x2b70   :  { %1957 = vrot.lane.b32.xlu1 %v2709_v3, %s2789_s25 }
0x2be2   :  { %v1958_v4 = vpop.permute.xlu1 %1957 }
0x2be3   :  { %v1960_v5 = vmul.f32 %v2707_v52, %v1958_v4 }
0x2be5   :  { %v1973_v33 = vrot.slane %v1960_v5, 6 }
0x2be7   :  { %1974 = vrot.lane.b32.xlu0 %v1973_v33, %s2790_s3 }
0x2c59   :  { %v1975_v6 = vpop.permute.xlu0 %1974 }
0x2c5a   :  { %2436 = vmatmul.mubr.msk.f32.vlgmr.msra.gmra.mrb[20].mxu1 %vm171_vm3, %v1975_v6 }
0x2d2d   :  { %v2044_v8 = vpop.f32.mrb[20].mxu1 }
0x2d2e   :  { %v2045_v9 = vadd.f32 %v2103_v7, %v2044_v8  ;;  %v2437_v10 = vpop.f32.mrb[21].mxu1 }
0x2d30   :  { %2049 = vst.msk [vmem:[#allocation7] sm:$0x3] %vm2048_vm6, %v2045_v9 }
0x2d31   :  { %2765 = shalt.err (!%p2762_p6)
}
0x2d32   :  { %s2766_s27 = scalar_lea.hbm %s3184_s9, 32 }
0x2d33   :  { %p2767_p7 = scmp.ne.s32.totalorder %s3184_s9, %s2766_s27  ;;  %p2770_p8 = scmp.lt.u32.totalorder %s2766_s27, %s3184_s9 }
0x2d35   :  { %p2772_p9 = pnand %p2770_p8, %p2767_p7 }
0x2d37   :  { %2775 = shalt.err (!%p2772_p9)
}
0x2d38   :  { %2059 = dma.vmem_to_hbm [thread:$0]  %s2057_s26, 32, %s3184_s9, [#allocation4]  }
0x2d39   :  { %2780 = dma.done.wait [#allocation4], 32  }
0x2d3a   :  { %2781 = vsyncadd [#allocation4], 4294967264 }
0x2d3b   :  { %2063 = vsyncpa [#allocation3], 1 }
0x2d3c   :  { %2064 = vsyncpa [#allocation6], 1 }
0x2d3d   :  { %2065 = vsyncpa [#allocation4], 1 }

</bundles_post_ra>
